<compile_context>
chip_gen: v5e
topology: v5e:2x2
jax: 0.10.0
libtpu: 0.0.40
codegen_flags: <defaults>
</compile_context>

<pallas_src>
import math

import jax
import jax.numpy as jnp
from jax import lax
from jax.experimental import pallas as pl
from jax.experimental.pallas import tpu as pltpu

# ----------------------------- small config ---------------------------------
VOCAB = 128
HIDDEN = 32
N_LAYERS = 2
N_HEADS = 2
HEAD_DIM = 16          # N_HEADS * HEAD_DIM == HIDDEN
INTER = 64
BATCH = 2
SEQ = 8
RMS_EPS = 1e-6
ATTN_SOFTCAP = 50.0
ROPE_THETA = 10000.0
EMB_NORMALIZER = math.sqrt(HIDDEN)

QKV_DIM = N_HEADS * HEAD_DIM                 # 32
ATTN_SCALE = HEAD_DIM ** -0.5
SOFTCAP_INNER = ATTN_SCALE / ATTN_SOFTCAP    # fold 1/head_dim^0.5 and 1/cap
MASK_VALUE = -1e30                           # safe: exp(-1e30) == 0 in f32


def _vmem_spec():
    # whole-array block resident in VMEM (all shapes here are tiny)
    return pl.BlockSpec(memory_space=pltpu.MemorySpace.VMEM)


# ----------------------------- kernel helpers --------------------------------
def _rms_plain(x2d):
    # un-weighted Gemma RMSNorm core: x * rsqrt(mean(x^2) + eps)
    var = jnp.mean(x2d * x2d, axis=-1, keepdims=True)
    return x2d * lax.rsqrt(var + RMS_EPS)


def _split_heads(x_flat):
    # (B*S, H*D) -> (H*B, S, D); head becomes part of the batch dim so both
    # heads go through ONE batched einsum.
    x3 = x_flat.reshape(BATCH, SEQ, QKV_DIM)
    return jnp.concatenate(
        [x3[:, :, h * HEAD_DIM:(h + 1) * HEAD_DIM] for h in range(N_HEADS)],
        axis=0)


def _merge_heads(x_bh):
    # (H*B, S, D) -> (B*S, H*D), heads concatenated back along lanes.
    parts = [x_bh[h * BATCH:(h + 1) * BATCH] for h in range(N_HEADS)]
    return jnp.concatenate(parts, axis=-1).reshape(BATCH * SEQ, QKV_DIM)


# ----------------------------- fused kernel ----------------------------------
def fused_forward_kernel(ids_ref,                       # SMEM (B*S,) int32
                         emb_ref, cos_ref, sin_ref,
                         wqkv_ref, wo_ref, wgu_ref, wdown_ref,
                         postw_ref, finalw_ref, out_ref):
    # ---- embedding lookup (one-hot matmul on the MXU); table pre-scaled by
    #      sqrt(HIDDEN) in pack_params ----
    lane = lax.broadcasted_iota(jnp.int32, (1, VOCAB), 1)
    onehot = jnp.concatenate(
        [(lane == ids_ref[r]).astype(jnp.float32) for r in range(BATCH * SEQ)],
        axis=0)                                               # (B*S, V)
    h = jnp.dot(onehot, emb_ref[...],
                preferred_element_type=jnp.float32)           # (B*S, HIDDEN)

    # ---- invariants hoisted out of the layer loop ----
    cos = cos_ref[...]            # (B*S, QKV_DIM), per-head tiled
    sin = sin_ref[...]            # (B*S, QKV_DIM), rotate_half sign pre-folded
    row = lax.broadcasted_iota(jnp.int32, (SEQ, SEQ), 0)
    col = lax.broadcasted_iota(jnp.int32, (SEQ, SEQ), 1)
    causal = (col <= row)[None, :, :]                          # (1, S, S)

    # ---- statically unrolled decoder layers ----
    for l in range(N_LAYERS):
        # ---------------- attention branch ----------------
        # (1+ln1) is folded into wqkv rows -> plain rsqrt norm here.
        x = _rms_plain(h)
        # qkv layout: [ q | q_swapped | k | k_swapped | v ]  (5 * QKV_DIM)
        qkv = jnp.dot(x, wqkv_ref[l],
                      preferred_element_type=jnp.float32)     # (B*S, 5*QKV)
        q = qkv[:, 0 * QKV_DIM:1 * QKV_DIM] * cos + qkv[:, 1 * QKV_DIM:2 * QKV_DIM] * sin
        k = qkv[:, 2 * QKV_DIM:3 * QKV_DIM] * cos + qkv[:, 3 * QKV_DIM:4 * QKV_DIM] * sin
        v = qkv[:, 4 * QKV_DIM:5 * QKV_DIM]

        q_bh = _split_heads(q)                                # (H*B, S, D)
        k_bh = _split_heads(k)
        v_bh = _split_heads(v)

        s = jnp.einsum('bqd,bkd->bqk', q_bh, k_bh,
                       preferred_element_type=jnp.float32)    # (H*B, S, S)
        # Gemma2 logit softcapping (scale and 1/cap folded into one const),
        # then causal mask.  No max-subtraction needed: |logits| <= 50.
        s = ATTN_SOFTCAP * jnp.tanh(s * SOFTCAP_INNER)
        s = jnp.where(causal, s, MASK_VALUE)
        p = jnp.exp(s)
        denom = jnp.sum(p, axis=-1, keepdims=True)
        probs = p / denom                                     # exact softmax
        ctx = jnp.einsum('bqk,bkd->bqd', probs, v_bh,
                         preferred_element_type=jnp.float32)  # (H*B, S, D)

        attn = _merge_heads(ctx)                              # (B*S, QKV_DIM)
        attn = jnp.dot(attn, wo_ref[l],
                       preferred_element_type=jnp.float32)    # one o-proj matmul
        pw = postw_ref[l]                                     # (2, HIDDEN): (1+ln2, 1+ln4)
        h = h + _rms_plain(attn) * pw[0:1, :]                 # post_attention_layernorm

        # ---------------- MLP branch (GeGLU, fused gate|up) ----------------
        # (1+ln3) is folded into wgu rows -> plain rsqrt norm here.
        x = _rms_plain(h)
        gu = jnp.dot(x, wgu_ref[l],
                     preferred_element_type=jnp.float32)      # (B*S, 2*INTER) = (16, 128)
        act = jax.nn.gelu(gu[:, :INTER], approximate=True) * gu[:, INTER:]
        mlp = jnp.dot(act, wdown_ref[l],
                      preferred_element_type=jnp.float32)     # (B*S, HIDDEN)
        h = h + _rms_plain(mlp) * pw[1:2, :]                  # post_feedforward_layernorm

    # ---- final RMSNorm (weight passed as precomputed 1+w) ----
    out_ref[...] = _rms_plain(h) * finalw_ref[...]


# ----------------------------- one-time packing -------------------------------
def _rope_tables():
    inv_freq = 1.0 / (ROPE_THETA ** (jnp.arange(0, HEAD_DIM, 2, dtype=jnp.float32)
                                     / HEAD_DIM))
    pos = jnp.arange(SEQ, dtype=jnp.float32)
    freqs = jnp.outer(pos, inv_freq)                          # (S, D/2)
    emb = jnp.concatenate([freqs, freqs], axis=-1)            # (S, D)
    cos = jnp.cos(emb)
    sin = jnp.sin(emb)
    half = HEAD_DIM // 2
    # fold rotate_half sign into sin: first half negated
    sign = jnp.concatenate([-jnp.ones((half,), jnp.float32),
                            jnp.ones((half,), jnp.float32)])
    sin_signed = sin * sign
    # tile per head (lanes) and per batch (rows): row r = b*S + s uses pos s
    cos_full = jnp.tile(cos, (BATCH, N_HEADS))                # (B*S, QKV_DIM)
    sin_full = jnp.tile(sin_signed, (BATCH, N_HEADS))
    return cos_full, sin_full


def _swap_perm():
    # column permutation implementing the rotate_half half-swap per head
    half = HEAD_DIM // 2
    idx = []
    for hh in range(N_HEADS):
        base = hh * HEAD_DIM
        idx += list(range(base + half, base + HEAD_DIM))
        idx += list(range(base, base + half))
    return jnp.array(idx, dtype=jnp.int32)


def pack_params(params):
    """One-time packing: fold constant scales into weights, build RoPE tables,
    stack per-layer weights on a leading layer axis."""
    emb = params["embedding"] * EMB_NORMALIZER
    cos_full, sin_full = _rope_tables()
    perm = _swap_perm()

    wqkv_l, wo_l, wgu_l, wdown_l, postw_l = [], [], [], [], []
    for l in params["layers"]:
        s1 = (1.0 + l["ln1"])[:, None]        # fold input_layernorm into rows
        s3 = (1.0 + l["ln3"])[:, None]        # fold pre_feedforward_layernorm
        wq = s1 * l["wq"]
        wk = s1 * l["wk"]
        wv = s1 * l["wv"]
        # [ q | q_swapped_cols | k | k_swapped_cols | v ] -> RoPE swap is free
        wqkv_l.append(jnp.concatenate(
            [wq, wq[:, perm], wk, wk[:, perm], wv], axis=1))        # (H, 5*QKV)
        wo_l.append(l["wo"])                                        # (QKV, H)
        wgu_l.append(s3 * jnp.concatenate([l["wgate"], l["wup"]], axis=1))
        wdown_l.append(l["wdown"])                                  # (INTER, H)
        postw_l.append(jnp.stack([1.0 + l["ln2"], 1.0 + l["ln4"]]))  # (2, H)

    packed = dict(
        emb=emb, cos=cos_full, sin=sin_full,
        wqkv=jnp.stack(wqkv_l),          # (L, H, 5*QKV)
        wo=jnp.stack(wo_l),              # (L, QKV, H)
        wgu=jnp.stack(wgu_l),            # (L, H, 2*INTER)
        wdown=jnp.stack(wdown_l),        # (L, INTER, H)
        postw=jnp.stack(postw_l),        # (L, 2, H)
        finalw=(1.0 + params["final_norm"]).reshape(1, HIDDEN),
    )
    return jax.tree_util.tree_map(jnp.asarray, packed)


# ----------------------------- forward wrapper --------------------------------
@jax.jit
def gemma2_like_forward(input_ids, packed):
    ids_flat = input_ids.reshape(BATCH * SEQ).astype(jnp.int32)
    h2d = pl.pallas_call(
        fused_forward_kernel,
        out_shape=jax.ShapeDtypeStruct((BATCH * SEQ, HIDDEN), jnp.float32),
        grid_spec=pltpu.PrefetchScalarGridSpec(
            num_scalar_prefetch=1,          # input_ids live in SMEM
            grid=(),
            in_specs=[_vmem_spec()] * 9,
            out_specs=_vmem_spec(),
        ),
    )(ids_flat,
      packed["emb"], packed["cos"], packed["sin"],
      packed["wqkv"], packed["wo"], packed["wgu"], packed["wdown"],
      packed["postw"], packed["finalw"])
    return h2d.reshape(BATCH, SEQ, HIDDEN)


# ----------------------------- param init ------------------------------------
def init_params(key):
    keys = jax.random.split(key, 2 + N_LAYERS)
    params = {
        "embedding": jax.random.normal(keys[0], (VOCAB, HIDDEN), jnp.float32) * 0.02,
        "final_norm": jax.random.normal(keys[1], (HIDDEN,), jnp.float32) * 0.1,
        "layers": [],
    }
    for l in range(N_LAYERS):
        k = jax.random.split(keys[2 + l], 11)
        params["layers"].append(dict(
            ln1=jax.random.normal(k[0], (HIDDEN,), jnp.float32) * 0.1,
            ln2=jax.random.normal(k[1], (HIDDEN,), jnp.float32) * 0.1,
            ln3=jax.random.normal(k[2], (HIDDEN,), jnp.float32) * 0.1,
            ln4=jax.random.normal(k[3], (HIDDEN,), jnp.float32) * 0.1,
            wq=jax.random.normal(k[4], (HIDDEN, N_HEADS * HEAD_DIM), jnp.float32) * 0.05,
            wk=jax.random.normal(k[5], (HIDDEN, N_HEADS * HEAD_DIM), jnp.float32) * 0.05,
            wv=jax.random.normal(k[6], (HIDDEN, N_HEADS * HEAD_DIM), jnp.float32) * 0.05,
            wo=jax.random.normal(k[7], (N_HEADS * HEAD_DIM, HIDDEN), jnp.float32) * 0.05,
            wgate=jax.random.normal(k[8], (HIDDEN, INTER), jnp.float32) * 0.05,
            wup=jax.random.normal(k[9], (HIDDEN, INTER), jnp.float32) * 0.05,
            wdown=jax.random.normal(k[10], (INTER, HIDDEN), jnp.float32) * 0.05,
        ))
    return params


if __name__ == "__main__":
    root = jax.random.PRNGKey(0)
    k_ids, k_params = jax.random.split(root)
    params = init_params(k_params)
    packed = pack_params(params)                 # one-time, outside the hot path
    input_ids = jax.random.randint(k_ids, (BATCH, SEQ), 0, VOCAB, dtype=jnp.int32)

    out = gemma2_like_forward(input_ids, packed)
    out = jax.block_until_ready(out)

    assert out.shape == (BATCH, SEQ, HIDDEN), out.shape
    assert out.dtype == jnp.float32
    assert bool(jnp.all(jnp.isfinite(out)))
    print("KERNEL_OK")
</pallas_src>

<mosaic_0001>
module attributes {stable_mosaic.version = 11 : i64} {
  func.func @fused_forward_kernel(%arg0: memref<16xi32, #tpu.memory_space<smem>>, %arg1: memref<128x32xf32, #tpu.memory_space<vmem>>, %arg2: memref<16x32xf32, #tpu.memory_space<vmem>>, %arg3: memref<16x32xf32, #tpu.memory_space<vmem>>, %arg4: memref<2x32x160xf32, #tpu.memory_space<vmem>>, %arg5: memref<2x32x32xf32, #tpu.memory_space<vmem>>, %arg6: memref<2x32x128xf32, #tpu.memory_space<vmem>>, %arg7: memref<2x64x32xf32, #tpu.memory_space<vmem>>, %arg8: memref<2x2x32xf32, #tpu.memory_space<vmem>>, %arg9: memref<1x32xf32, #tpu.memory_space<vmem>>, %arg10: memref<16x32xf32, #tpu.memory_space<vmem>>) attributes {dimension_semantics = [], scalar_prefetch = 1 : i64, scratch_operands = 0 : i64, tpu.core_type = #tpu.core_type<tc>} {
    %0 = tpu.iota {dimensions = array<i32: 1>} : vector<1x128xi32>
    %c0 = arith.constant 0 : index
    %1 = memref.load %arg0[%c0] : memref<16xi32, #tpu.memory_space<smem>>
    %2 = vector.broadcast %1 : i32 to vector<1x128xi32>
    %3 = arith.cmpi eq, %0, %2 : vector<1x128xi32>
    %4 = arith.extui %3 : vector<1x128xi1> to vector<1x128xi32>
    %5 = arith.sitofp %4 : vector<1x128xi32> to vector<1x128xf32>
    %c1 = arith.constant 1 : index
    %6 = memref.load %arg0[%c1] : memref<16xi32, #tpu.memory_space<smem>>
    %7 = vector.broadcast %6 : i32 to vector<1x128xi32>
    %8 = arith.cmpi eq, %0, %7 : vector<1x128xi32>
    %9 = arith.extui %8 : vector<1x128xi1> to vector<1x128xi32>
    %10 = arith.sitofp %9 : vector<1x128xi32> to vector<1x128xf32>
    %c2 = arith.constant 2 : index
    %11 = memref.load %arg0[%c2] : memref<16xi32, #tpu.memory_space<smem>>
    %12 = vector.broadcast %11 : i32 to vector<1x128xi32>
    %13 = arith.cmpi eq, %0, %12 : vector<1x128xi32>
    %14 = arith.extui %13 : vector<1x128xi1> to vector<1x128xi32>
    %15 = arith.sitofp %14 : vector<1x128xi32> to vector<1x128xf32>
    %c3 = arith.constant 3 : index
    %16 = memref.load %arg0[%c3] : memref<16xi32, #tpu.memory_space<smem>>
    %17 = vector.broadcast %16 : i32 to vector<1x128xi32>
    %18 = arith.cmpi eq, %0, %17 : vector<1x128xi32>
    %19 = arith.extui %18 : vector<1x128xi1> to vector<1x128xi32>
    %20 = arith.sitofp %19 : vector<1x128xi32> to vector<1x128xf32>
    %c4 = arith.constant 4 : index
    %21 = memref.load %arg0[%c4] : memref<16xi32, #tpu.memory_space<smem>>
    %22 = vector.broadcast %21 : i32 to vector<1x128xi32>
    %23 = arith.cmpi eq, %0, %22 : vector<1x128xi32>
    %24 = arith.extui %23 : vector<1x128xi1> to vector<1x128xi32>
    %25 = arith.sitofp %24 : vector<1x128xi32> to vector<1x128xf32>
    %c5 = arith.constant 5 : index
    %26 = memref.load %arg0[%c5] : memref<16xi32, #tpu.memory_space<smem>>
    %27 = vector.broadcast %26 : i32 to vector<1x128xi32>
    %28 = arith.cmpi eq, %0, %27 : vector<1x128xi32>
    %29 = arith.extui %28 : vector<1x128xi1> to vector<1x128xi32>
    %30 = arith.sitofp %29 : vector<1x128xi32> to vector<1x128xf32>
    %c6 = arith.constant 6 : index
    %31 = memref.load %arg0[%c6] : memref<16xi32, #tpu.memory_space<smem>>
    %32 = vector.broadcast %31 : i32 to vector<1x128xi32>
    %33 = arith.cmpi eq, %0, %32 : vector<1x128xi32>
    %34 = arith.extui %33 : vector<1x128xi1> to vector<1x128xi32>
    %35 = arith.sitofp %34 : vector<1x128xi32> to vector<1x128xf32>
    %c7 = arith.constant 7 : index
    %36 = memref.load %arg0[%c7] : memref<16xi32, #tpu.memory_space<smem>>
    %37 = vector.broadcast %36 : i32 to vector<1x128xi32>
    %38 = arith.cmpi eq, %0, %37 : vector<1x128xi32>
    %39 = arith.extui %38 : vector<1x128xi1> to vector<1x128xi32>
    %40 = arith.sitofp %39 : vector<1x128xi32> to vector<1x128xf32>
    %c8 = arith.constant 8 : index
    %41 = memref.load %arg0[%c8] : memref<16xi32, #tpu.memory_space<smem>>
    %42 = vector.broadcast %41 : i32 to vector<1x128xi32>
    %43 = arith.cmpi eq, %0, %42 : vector<1x128xi32>
    %44 = arith.extui %43 : vector<1x128xi1> to vector<1x128xi32>
    %45 = arith.sitofp %44 : vector<1x128xi32> to vector<1x128xf32>
    %c9 = arith.constant 9 : index
    %46 = memref.load %arg0[%c9] : memref<16xi32, #tpu.memory_space<smem>>
    %47 = vector.broadcast %46 : i32 to vector<1x128xi32>
    %48 = arith.cmpi eq, %0, %47 : vector<1x128xi32>
    %49 = arith.extui %48 : vector<1x128xi1> to vector<1x128xi32>
    %50 = arith.sitofp %49 : vector<1x128xi32> to vector<1x128xf32>
    %c10 = arith.constant 10 : index
    %51 = memref.load %arg0[%c10] : memref<16xi32, #tpu.memory_space<smem>>
    %52 = vector.broadcast %51 : i32 to vector<1x128xi32>
    %53 = arith.cmpi eq, %0, %52 : vector<1x128xi32>
    %54 = arith.extui %53 : vector<1x128xi1> to vector<1x128xi32>
    %55 = arith.sitofp %54 : vector<1x128xi32> to vector<1x128xf32>
    %c11 = arith.constant 11 : index
    %56 = memref.load %arg0[%c11] : memref<16xi32, #tpu.memory_space<smem>>
    %57 = vector.broadcast %56 : i32 to vector<1x128xi32>
    %58 = arith.cmpi eq, %0, %57 : vector<1x128xi32>
    %59 = arith.extui %58 : vector<1x128xi1> to vector<1x128xi32>
    %60 = arith.sitofp %59 : vector<1x128xi32> to vector<1x128xf32>
    %c12 = arith.constant 12 : index
    %61 = memref.load %arg0[%c12] : memref<16xi32, #tpu.memory_space<smem>>
    %62 = vector.broadcast %61 : i32 to vector<1x128xi32>
    %63 = arith.cmpi eq, %0, %62 : vector<1x128xi32>
    %64 = arith.extui %63 : vector<1x128xi1> to vector<1x128xi32>
    %65 = arith.sitofp %64 : vector<1x128xi32> to vector<1x128xf32>
    %c13 = arith.constant 13 : index
    %66 = memref.load %arg0[%c13] : memref<16xi32, #tpu.memory_space<smem>>
    %67 = vector.broadcast %66 : i32 to vector<1x128xi32>
    %68 = arith.cmpi eq, %0, %67 : vector<1x128xi32>
    %69 = arith.extui %68 : vector<1x128xi1> to vector<1x128xi32>
    %70 = arith.sitofp %69 : vector<1x128xi32> to vector<1x128xf32>
    %c14 = arith.constant 14 : index
    %71 = memref.load %arg0[%c14] : memref<16xi32, #tpu.memory_space<smem>>
    %72 = vector.broadcast %71 : i32 to vector<1x128xi32>
    %73 = arith.cmpi eq, %0, %72 : vector<1x128xi32>
    %74 = arith.extui %73 : vector<1x128xi1> to vector<1x128xi32>
    %75 = arith.sitofp %74 : vector<1x128xi32> to vector<1x128xf32>
    %c15 = arith.constant 15 : index
    %76 = memref.load %arg0[%c15] : memref<16xi32, #tpu.memory_space<smem>>
    %77 = vector.broadcast %76 : i32 to vector<1x128xi32>
    %78 = arith.cmpi eq, %0, %77 : vector<1x128xi32>
    %79 = arith.extui %78 : vector<1x128xi1> to vector<1x128xi32>
    %80 = arith.sitofp %79 : vector<1x128xi32> to vector<1x128xf32>
    %81 = tpu.concatenate %5, %10, %15, %20, %25, %30, %35, %40, %45, %50, %55, %60, %65, %70, %75, %80 in 0 : vector<1x128xf32>, vector<1x128xf32>, vector<1x128xf32>, vector<1x128xf32>, vector<1x128xf32>, vector<1x128xf32>, vector<1x128xf32>, vector<1x128xf32>, vector<1x128xf32>, vector<1x128xf32>, vector<1x128xf32>, vector<1x128xf32>, vector<1x128xf32>, vector<1x128xf32>, vector<1x128xf32>, vector<1x128xf32> -> vector<16x128xf32>
    %c0_0 = arith.constant 0 : index
    %c0_1 = arith.constant 0 : index
    %82 = vector.load %arg1[%c0_0, %c0_1] : memref<128x32xf32, #tpu.memory_space<vmem>>, vector<128x32xf32>
    %cst = arith.constant dense<0.000000e+00> : vector<16x32xf32>
    %83 = tpu.matmul %81, %82, %cst {dimension_numbers = #tpu.dot_dimension_numbers<[1], [0], [0], [1], [0, 0, 1, 1], [], []>} : vector<16x128xf32>, vector<128x32xf32>, vector<16x32xf32> -> vector<16x32xf32>
    %c0_2 = arith.constant 0 : index
    %c0_3 = arith.constant 0 : index
    %84 = vector.load %arg2[%c0_2, %c0_3] : memref<16x32xf32, #tpu.memory_space<vmem>>, vector<16x32xf32>
    %c0_4 = arith.constant 0 : index
    %c0_5 = arith.constant 0 : index
    %85 = vector.load %arg3[%c0_4, %c0_5] : memref<16x32xf32, #tpu.memory_space<vmem>>, vector<16x32xf32>
    %86 = tpu.iota {dimensions = array<i32: 0>} : vector<8x8xi32>
    %87 = tpu.iota {dimensions = array<i32: 1>} : vector<8x8xi32>
    %88 = arith.cmpi sle, %87, %86 : vector<8x8xi32>
    %89 = vector.shape_cast %88 : vector<8x8xi1> to vector<1x8x8xi1>
    %90 = arith.mulf %83, %83 : vector<16x32xf32>
    %cst_6 = arith.constant dense<0.000000e+00> : vector<16xf32>
    %91 = vector.multi_reduction <add>, %90, %cst_6 [1] : vector<16x32xf32> to vector<16xf32>
    %92 = vector.shape_cast %91 : vector<16xf32> to vector<16x1xf32>
    %cst_7 = arith.constant 3.200000e+01 : f32
    %93 = vector.broadcast %cst_7 : f32 to vector<16x1xf32>
    %94 = arith.divf %92, %93 : vector<16x1xf32>
    %cst_8 = arith.constant 9.99999997E-7 : f32
    %95 = vector.broadcast %cst_8 : f32 to vector<16x1xf32>
    %96 = arith.addf %94, %95 : vector<16x1xf32>
    %97 = math.rsqrt %96 : vector<16x1xf32>
    %98 = vector.broadcast %97 : vector<16x1xf32> to vector<16x32xf32>
    %99 = arith.mulf %83, %98 : vector<16x32xf32>
    %c0_9 = arith.constant 0 : index
    %c0_10 = arith.constant 0 : index
    %c0_11 = arith.constant 0 : index
    %100 = vector.load %arg4[%c0_9, %c0_10, %c0_11] : memref<2x32x160xf32, #tpu.memory_space<vmem>>, vector<1x32x160xf32>
    %101 = vector.shape_cast %100 : vector<1x32x160xf32> to vector<32x160xf32>
    %cst_12 = arith.constant dense<0.000000e+00> : vector<16x160xf32>
    %102 = tpu.matmul %99, %101, %cst_12 {dimension_numbers = #tpu.dot_dimension_numbers<[1], [0], [0], [1], [0, 0, 1, 1], [], []>} : vector<16x32xf32>, vector<32x160xf32>, vector<16x160xf32> -> vector<16x160xf32>
    %103 = vector.extract_strided_slice %102 {offsets = [0, 0], sizes = [16, 32], strides = [1, 1]} : vector<16x160xf32> to vector<16x32xf32>
    %104 = arith.mulf %103, %84 : vector<16x32xf32>
    %105 = vector.extract_strided_slice %102 {offsets = [0, 32], sizes = [16, 32], strides = [1, 1]} : vector<16x160xf32> to vector<16x32xf32>
    %106 = arith.mulf %105, %85 : vector<16x32xf32>
    %107 = arith.addf %104, %106 : vector<16x32xf32>
    %108 = vector.extract_strided_slice %102 {offsets = [0, 64], sizes = [16, 32], strides = [1, 1]} : vector<16x160xf32> to vector<16x32xf32>
    %109 = arith.mulf %108, %84 : vector<16x32xf32>
    %110 = vector.extract_strided_slice %102 {offsets = [0, 96], sizes = [16, 32], strides = [1, 1]} : vector<16x160xf32> to vector<16x32xf32>
    %111 = arith.mulf %110, %85 : vector<16x32xf32>
    %112 = arith.addf %109, %111 : vector<16x32xf32>
    %113 = vector.extract_strided_slice %102 {offsets = [0, 128], sizes = [16, 32], strides = [1, 1]} : vector<16x160xf32> to vector<16x32xf32>
    %114 = vector.shape_cast %107 : vector<16x32xf32> to vector<2x8x32xf32>
    %115 = vector.extract_strided_slice %114 {offsets = [0, 0, 0], sizes = [2, 8, 16], strides = [1, 1, 1]} : vector<2x8x32xf32> to vector<2x8x16xf32>
    %116 = vector.extract_strided_slice %114 {offsets = [0, 0, 16], sizes = [2, 8, 16], strides = [1, 1, 1]} : vector<2x8x32xf32> to vector<2x8x16xf32>
    %117 = tpu.concatenate %115, %116 in 0 : vector<2x8x16xf32>, vector<2x8x16xf32> -> vector<4x8x16xf32>
    %118 = vector.shape_cast %112 : vector<16x32xf32> to vector<2x8x32xf32>
    %119 = vector.extract_strided_slice %118 {offsets = [0, 0, 0], sizes = [2, 8, 16], strides = [1, 1, 1]} : vector<2x8x32xf32> to vector<2x8x16xf32>
    %120 = vector.extract_strided_slice %118 {offsets = [0, 0, 16], sizes = [2, 8, 16], strides = [1, 1, 1]} : vector<2x8x32xf32> to vector<2x8x16xf32>
    %121 = tpu.concatenate %119, %120 in 0 : vector<2x8x16xf32>, vector<2x8x16xf32> -> vector<4x8x16xf32>
    %122 = vector.shape_cast %113 : vector<16x32xf32> to vector<2x8x32xf32>
    %123 = vector.extract_strided_slice %122 {offsets = [0, 0, 0], sizes = [2, 8, 16], strides = [1, 1, 1]} : vector<2x8x32xf32> to vector<2x8x16xf32>
    %124 = vector.extract_strided_slice %122 {offsets = [0, 0, 16], sizes = [2, 8, 16], strides = [1, 1, 1]} : vector<2x8x32xf32> to vector<2x8x16xf32>
    %125 = tpu.concatenate %123, %124 in 0 : vector<2x8x16xf32>, vector<2x8x16xf32> -> vector<4x8x16xf32>
    "tpu.trace_start"() <{level = 10 : i32, message = "bqd,bkd->bqk"}> : () -> ()
    %cst_13 = arith.constant dense<0.000000e+00> : vector<4x8x8xf32>
    %126 = tpu.matmul %117, %121, %cst_13 {dimension_numbers = #tpu.dot_dimension_numbers<[2], [2], [1], [1], [0, 0, 0, 1, 1, 1], [0], [0]>} : vector<4x8x16xf32>, vector<4x8x16xf32>, vector<4x8x8xf32> -> vector<4x8x8xf32>
    "tpu.trace_stop"() : () -> ()
    %cst_14 = arith.constant 5.000000e-03 : f32
    %127 = vector.broadcast %cst_14 : f32 to vector<4x8x8xf32>
    %128 = arith.mulf %126, %127 : vector<4x8x8xf32>
    %129 = math.tanh %128 : vector<4x8x8xf32>
    %cst_15 = arith.constant 5.000000e+01 : f32
    %130 = vector.broadcast %cst_15 : f32 to vector<4x8x8xf32>
    %131 = arith.mulf %130, %129 : vector<4x8x8xf32>
    %cst_16 = arith.constant -1.000000e+30 : f32
    %132 = vector.shape_cast %89 : vector<1x8x8xi1> to vector<1x8x8xi1>
    %133 = vector.broadcast %132 : vector<1x8x8xi1> to vector<4x8x8xi1>
    %134 = vector.broadcast %cst_16 : f32 to vector<4x8x8xf32>
    %135 = arith.select %133, %131, %134 : vector<4x8x8xi1>, vector<4x8x8xf32>
    %136 = math.exp %135 : vector<4x8x8xf32>
    %cst_17 = arith.constant dense<0.000000e+00> : vector<4x8xf32>
    %137 = vector.multi_reduction <add>, %136, %cst_17 [2] : vector<4x8x8xf32> to vector<4x8xf32>
    %138 = vector.shape_cast %137 : vector<4x8xf32> to vector<4x8x1xf32>
    %139 = vector.broadcast %138 : vector<4x8x1xf32> to vector<4x8x8xf32>
    %140 = arith.divf %136, %139 : vector<4x8x8xf32>
    "tpu.trace_start"() <{level = 10 : i32, message = "bqk,bkd->bqd"}> : () -> ()
    %cst_18 = arith.constant dense<0.000000e+00> : vector<4x8x16xf32>
    %141 = tpu.matmul %140, %125, %cst_18 {dimension_numbers = #tpu.dot_dimension_numbers<[2], [1], [1], [2], [0, 0, 0, 1, 1, 2], [0], [0]>} : vector<4x8x8xf32>, vector<4x8x16xf32>, vector<4x8x16xf32> -> vector<4x8x16xf32>
    "tpu.trace_stop"() : () -> ()
    %142 = vector.extract_strided_slice %141 {offsets = [0, 0, 0], sizes = [2, 8, 16], strides = [1, 1, 1]} : vector<4x8x16xf32> to vector<2x8x16xf32>
    %143 = vector.extract_strided_slice %141 {offsets = [2, 0, 0], sizes = [2, 8, 16], strides = [1, 1, 1]} : vector<4x8x16xf32> to vector<2x8x16xf32>
    %144 = tpu.concatenate %142, %143 in 2 : vector<2x8x16xf32>, vector<2x8x16xf32> -> vector<2x8x32xf32>
    %145 = vector.shape_cast %144 : vector<2x8x32xf32> to vector<16x32xf32>
    %c0_19 = arith.constant 0 : index
    %c0_20 = arith.constant 0 : index
    %c0_21 = arith.constant 0 : index
    %146 = vector.load %arg5[%c0_19, %c0_20, %c0_21] : memref<2x32x32xf32, #tpu.memory_space<vmem>>, vector<1x32x32xf32>
    %147 = vector.shape_cast %146 : vector<1x32x32xf32> to vector<32x32xf32>
    %cst_22 = arith.constant dense<0.000000e+00> : vector<16x32xf32>
    %148 = tpu.matmul %145, %147, %cst_22 {dimension_numbers = #tpu.dot_dimension_numbers<[1], [0], [0], [1], [0, 0, 1, 1], [], []>} : vector<16x32xf32>, vector<32x32xf32>, vector<16x32xf32> -> vector<16x32xf32>
    %c0_23 = arith.constant 0 : index
    %c0_24 = arith.constant 0 : index
    %c0_25 = arith.constant 0 : index
    %149 = vector.load %arg8[%c0_23, %c0_24, %c0_25] : memref<2x2x32xf32, #tpu.memory_space<vmem>>, vector<1x2x32xf32>
    %150 = vector.shape_cast %149 : vector<1x2x32xf32> to vector<2x32xf32>
    %151 = arith.mulf %148, %148 : vector<16x32xf32>
    %cst_26 = arith.constant dense<0.000000e+00> : vector<16xf32>
    %152 = vector.multi_reduction <add>, %151, %cst_26 [1] : vector<16x32xf32> to vector<16xf32>
    %153 = vector.shape_cast %152 : vector<16xf32> to vector<16x1xf32>
    %cst_27 = arith.constant 3.200000e+01 : f32
    %154 = vector.broadcast %cst_27 : f32 to vector<16x1xf32>
    %155 = arith.divf %153, %154 : vector<16x1xf32>
    %cst_28 = arith.constant 9.99999997E-7 : f32
    %156 = vector.broadcast %cst_28 : f32 to vector<16x1xf32>
    %157 = arith.addf %155, %156 : vector<16x1xf32>
    %158 = math.rsqrt %157 : vector<16x1xf32>
    %159 = vector.broadcast %158 : vector<16x1xf32> to vector<16x32xf32>
    %160 = arith.mulf %148, %159 : vector<16x32xf32>
    %161 = vector.extract_strided_slice %150 {offsets = [0, 0], sizes = [1, 32], strides = [1, 1]} : vector<2x32xf32> to vector<1x32xf32>
    %162 = vector.broadcast %161 : vector<1x32xf32> to vector<16x32xf32>
    %163 = arith.mulf %160, %162 : vector<16x32xf32>
    %164 = arith.addf %83, %163 : vector<16x32xf32>
    %165 = arith.mulf %164, %164 : vector<16x32xf32>
    %cst_29 = arith.constant dense<0.000000e+00> : vector<16xf32>
    %166 = vector.multi_reduction <add>, %165, %cst_29 [1] : vector<16x32xf32> to vector<16xf32>
    %167 = vector.shape_cast %166 : vector<16xf32> to vector<16x1xf32>
    %cst_30 = arith.constant 3.200000e+01 : f32
    %168 = vector.broadcast %cst_30 : f32 to vector<16x1xf32>
    %169 = arith.divf %167, %168 : vector<16x1xf32>
    %cst_31 = arith.constant 9.99999997E-7 : f32
    %170 = vector.broadcast %cst_31 : f32 to vector<16x1xf32>
    %171 = arith.addf %169, %170 : vector<16x1xf32>
    %172 = math.rsqrt %171 : vector<16x1xf32>
    %173 = vector.broadcast %172 : vector<16x1xf32> to vector<16x32xf32>
    %174 = arith.mulf %164, %173 : vector<16x32xf32>
    %c0_32 = arith.constant 0 : index
    %c0_33 = arith.constant 0 : index
    %c0_34 = arith.constant 0 : index
    %175 = vector.load %arg6[%c0_32, %c0_33, %c0_34] : memref<2x32x128xf32, #tpu.memory_space<vmem>>, vector<1x32x128xf32>
    %176 = vector.shape_cast %175 : vector<1x32x128xf32> to vector<32x128xf32>
    %cst_35 = arith.constant dense<0.000000e+00> : vector<16x128xf32>
    %177 = tpu.matmul %174, %176, %cst_35 {dimension_numbers = #tpu.dot_dimension_numbers<[1], [0], [0], [1], [0, 0, 1, 1], [], []>} : vector<16x32xf32>, vector<32x128xf32>, vector<16x128xf32> -> vector<16x128xf32>
    %178 = vector.extract_strided_slice %177 {offsets = [0, 0], sizes = [16, 64], strides = [1, 1]} : vector<16x128xf32> to vector<16x64xf32>
    %179 = arith.mulf %178, %178 : vector<16x64xf32>
    %180 = arith.mulf %178, %179 : vector<16x64xf32>
    %cst_36 = arith.constant 4.471500e-02 : f32
    %181 = vector.broadcast %cst_36 : f32 to vector<16x64xf32>
    %182 = arith.mulf %181, %180 : vector<16x64xf32>
    %183 = arith.addf %178, %182 : vector<16x64xf32>
    %cst_37 = arith.constant 0.797884583 : f32
    %184 = vector.broadcast %cst_37 : f32 to vector<16x64xf32>
    %185 = arith.mulf %184, %183 : vector<16x64xf32>
    %186 = math.tanh %185 : vector<16x64xf32>
    %cst_38 = arith.constant 1.000000e+00 : f32
    %187 = vector.broadcast %cst_38 : f32 to vector<16x64xf32>
    %188 = arith.addf %187, %186 : vector<16x64xf32>
    %cst_39 = arith.constant 5.000000e-01 : f32
    %189 = vector.broadcast %cst_39 : f32 to vector<16x64xf32>
    %190 = arith.mulf %189, %188 : vector<16x64xf32>
    %191 = arith.mulf %178, %190 : vector<16x64xf32>
    %192 = vector.extract_strided_slice %177 {offsets = [0, 64], sizes = [16, 64], strides = [1, 1]} : vector<16x128xf32> to vector<16x64xf32>
    %193 = arith.mulf %191, %192 : vector<16x64xf32>
    %c0_40 = arith.constant 0 : index
    %c0_41 = arith.constant 0 : index
    %c0_42 = arith.constant 0 : index
    %194 = vector.load %arg7[%c0_40, %c0_41, %c0_42] : memref<2x64x32xf32, #tpu.memory_space<vmem>>, vector<1x64x32xf32>
    %195 = vector.shape_cast %194 : vector<1x64x32xf32> to vector<64x32xf32>
    %cst_43 = arith.constant dense<0.000000e+00> : vector<16x32xf32>
    %196 = tpu.matmul %193, %195, %cst_43 {dimension_numbers = #tpu.dot_dimension_numbers<[1], [0], [0], [1], [0, 0, 1, 1], [], []>} : vector<16x64xf32>, vector<64x32xf32>, vector<16x32xf32> -> vector<16x32xf32>
    %197 = arith.mulf %196, %196 : vector<16x32xf32>
    %cst_44 = arith.constant dense<0.000000e+00> : vector<16xf32>
    %198 = vector.multi_reduction <add>, %197, %cst_44 [1] : vector<16x32xf32> to vector<16xf32>
    %199 = vector.shape_cast %198 : vector<16xf32> to vector<16x1xf32>
    %cst_45 = arith.constant 3.200000e+01 : f32
    %200 = vector.broadcast %cst_45 : f32 to vector<16x1xf32>
    %201 = arith.divf %199, %200 : vector<16x1xf32>
    %cst_46 = arith.constant 9.99999997E-7 : f32
    %202 = vector.broadcast %cst_46 : f32 to vector<16x1xf32>
    %203 = arith.addf %201, %202 : vector<16x1xf32>
    %204 = math.rsqrt %203 : vector<16x1xf32>
    %205 = vector.broadcast %204 : vector<16x1xf32> to vector<16x32xf32>
    %206 = arith.mulf %196, %205 : vector<16x32xf32>
    %207 = vector.extract_strided_slice %150 {offsets = [1, 0], sizes = [1, 32], strides = [1, 1]} : vector<2x32xf32> to vector<1x32xf32>
    %208 = vector.broadcast %207 : vector<1x32xf32> to vector<16x32xf32>
    %209 = arith.mulf %206, %208 : vector<16x32xf32>
    %210 = arith.addf %164, %209 : vector<16x32xf32>
    %211 = arith.mulf %210, %210 : vector<16x32xf32>
    %cst_47 = arith.constant dense<0.000000e+00> : vector<16xf32>
    %212 = vector.multi_reduction <add>, %211, %cst_47 [1] : vector<16x32xf32> to vector<16xf32>
    %213 = vector.shape_cast %212 : vector<16xf32> to vector<16x1xf32>
    %cst_48 = arith.constant 3.200000e+01 : f32
    %214 = vector.broadcast %cst_48 : f32 to vector<16x1xf32>
    %215 = arith.divf %213, %214 : vector<16x1xf32>
    %cst_49 = arith.constant 9.99999997E-7 : f32
    %216 = vector.broadcast %cst_49 : f32 to vector<16x1xf32>
    %217 = arith.addf %215, %216 : vector<16x1xf32>
    %218 = math.rsqrt %217 : vector<16x1xf32>
    %219 = vector.broadcast %218 : vector<16x1xf32> to vector<16x32xf32>
    %220 = arith.mulf %210, %219 : vector<16x32xf32>
    %c1_50 = arith.constant 1 : index
    %c0_51 = arith.constant 0 : index
    %c0_52 = arith.constant 0 : index
    %221 = vector.load %arg4[%c1_50, %c0_51, %c0_52] : memref<2x32x160xf32, #tpu.memory_space<vmem>>, vector<1x32x160xf32>
    %222 = vector.shape_cast %221 : vector<1x32x160xf32> to vector<32x160xf32>
    %cst_53 = arith.constant dense<0.000000e+00> : vector<16x160xf32>
    %223 = tpu.matmul %220, %222, %cst_53 {dimension_numbers = #tpu.dot_dimension_numbers<[1], [0], [0], [1], [0, 0, 1, 1], [], []>} : vector<16x32xf32>, vector<32x160xf32>, vector<16x160xf32> -> vector<16x160xf32>
    %224 = vector.extract_strided_slice %223 {offsets = [0, 0], sizes = [16, 32], strides = [1, 1]} : vector<16x160xf32> to vector<16x32xf32>
    %225 = arith.mulf %224, %84 : vector<16x32xf32>
    %226 = vector.extract_strided_slice %223 {offsets = [0, 32], sizes = [16, 32], strides = [1, 1]} : vector<16x160xf32> to vector<16x32xf32>
    %227 = arith.mulf %226, %85 : vector<16x32xf32>
    %228 = arith.addf %225, %227 : vector<16x32xf32>
    %229 = vector.extract_strided_slice %223 {offsets = [0, 64], sizes = [16, 32], strides = [1, 1]} : vector<16x160xf32> to vector<16x32xf32>
    %230 = arith.mulf %229, %84 : vector<16x32xf32>
    %231 = vector.extract_strided_slice %223 {offsets = [0, 96], sizes = [16, 32], strides = [1, 1]} : vector<16x160xf32> to vector<16x32xf32>
    %232 = arith.mulf %231, %85 : vector<16x32xf32>
    %233 = arith.addf %230, %232 : vector<16x32xf32>
    %234 = vector.extract_strided_slice %223 {offsets = [0, 128], sizes = [16, 32], strides = [1, 1]} : vector<16x160xf32> to vector<16x32xf32>
    %235 = vector.shape_cast %228 : vector<16x32xf32> to vector<2x8x32xf32>
    %236 = vector.extract_strided_slice %235 {offsets = [0, 0, 0], sizes = [2, 8, 16], strides = [1, 1, 1]} : vector<2x8x32xf32> to vector<2x8x16xf32>
    %237 = vector.extract_strided_slice %235 {offsets = [0, 0, 16], sizes = [2, 8, 16], strides = [1, 1, 1]} : vector<2x8x32xf32> to vector<2x8x16xf32>
    %238 = tpu.concatenate %236, %237 in 0 : vector<2x8x16xf32>, vector<2x8x16xf32> -> vector<4x8x16xf32>
    %239 = vector.shape_cast %233 : vector<16x32xf32> to vector<2x8x32xf32>
    %240 = vector.extract_strided_slice %239 {offsets = [0, 0, 0], sizes = [2, 8, 16], strides = [1, 1, 1]} : vector<2x8x32xf32> to vector<2x8x16xf32>
    %241 = vector.extract_strided_slice %239 {offsets = [0, 0, 16], sizes = [2, 8, 16], strides = [1, 1, 1]} : vector<2x8x32xf32> to vector<2x8x16xf32>
    %242 = tpu.concatenate %240, %241 in 0 : vector<2x8x16xf32>, vector<2x8x16xf32> -> vector<4x8x16xf32>
    %243 = vector.shape_cast %234 : vector<16x32xf32> to vector<2x8x32xf32>
    %244 = vector.extract_strided_slice %243 {offsets = [0, 0, 0], sizes = [2, 8, 16], strides = [1, 1, 1]} : vector<2x8x32xf32> to vector<2x8x16xf32>
    %245 = vector.extract_strided_slice %243 {offsets = [0, 0, 16], sizes = [2, 8, 16], strides = [1, 1, 1]} : vector<2x8x32xf32> to vector<2x8x16xf32>
    %246 = tpu.concatenate %244, %245 in 0 : vector<2x8x16xf32>, vector<2x8x16xf32> -> vector<4x8x16xf32>
    "tpu.trace_start"() <{level = 10 : i32, message = "bqd,bkd->bqk"}> : () -> ()
    %cst_54 = arith.constant dense<0.000000e+00> : vector<4x8x8xf32>
    %247 = tpu.matmul %238, %242, %cst_54 {dimension_numbers = #tpu.dot_dimension_numbers<[2], [2], [1], [1], [0, 0, 0, 1, 1, 1], [0], [0]>} : vector<4x8x16xf32>, vector<4x8x16xf32>, vector<4x8x8xf32> -> vector<4x8x8xf32>
    "tpu.trace_stop"() : () -> ()
    %cst_55 = arith.constant 5.000000e-03 : f32
    %248 = vector.broadcast %cst_55 : f32 to vector<4x8x8xf32>
    %249 = arith.mulf %247, %248 : vector<4x8x8xf32>
    %250 = math.tanh %249 : vector<4x8x8xf32>
    %cst_56 = arith.constant 5.000000e+01 : f32
    %251 = vector.broadcast %cst_56 : f32 to vector<4x8x8xf32>
    %252 = arith.mulf %251, %250 : vector<4x8x8xf32>
    %cst_57 = arith.constant -1.000000e+30 : f32
    %253 = vector.shape_cast %89 : vector<1x8x8xi1> to vector<1x8x8xi1>
    %254 = vector.broadcast %253 : vector<1x8x8xi1> to vector<4x8x8xi1>
    %255 = vector.broadcast %cst_57 : f32 to vector<4x8x8xf32>
    %256 = arith.select %254, %252, %255 : vector<4x8x8xi1>, vector<4x8x8xf32>
    %257 = math.exp %256 : vector<4x8x8xf32>
    %cst_58 = arith.constant dense<0.000000e+00> : vector<4x8xf32>
    %258 = vector.multi_reduction <add>, %257, %cst_58 [2] : vector<4x8x8xf32> to vector<4x8xf32>
    %259 = vector.shape_cast %258 : vector<4x8xf32> to vector<4x8x1xf32>
    %260 = vector.broadcast %259 : vector<4x8x1xf32> to vector<4x8x8xf32>
    %261 = arith.divf %257, %260 : vector<4x8x8xf32>
    "tpu.trace_start"() <{level = 10 : i32, message = "bqk,bkd->bqd"}> : () -> ()
    %cst_59 = arith.constant dense<0.000000e+00> : vector<4x8x16xf32>
    %262 = tpu.matmul %261, %246, %cst_59 {dimension_numbers = #tpu.dot_dimension_numbers<[2], [1], [1], [2], [0, 0, 0, 1, 1, 2], [0], [0]>} : vector<4x8x8xf32>, vector<4x8x16xf32>, vector<4x8x16xf32> -> vector<4x8x16xf32>
    "tpu.trace_stop"() : () -> ()
    %263 = vector.extract_strided_slice %262 {offsets = [0, 0, 0], sizes = [2, 8, 16], strides = [1, 1, 1]} : vector<4x8x16xf32> to vector<2x8x16xf32>
    %264 = vector.extract_strided_slice %262 {offsets = [2, 0, 0], sizes = [2, 8, 16], strides = [1, 1, 1]} : vector<4x8x16xf32> to vector<2x8x16xf32>
    %265 = tpu.concatenate %263, %264 in 2 : vector<2x8x16xf32>, vector<2x8x16xf32> -> vector<2x8x32xf32>
    %266 = vector.shape_cast %265 : vector<2x8x32xf32> to vector<16x32xf32>
    %c1_60 = arith.constant 1 : index
    %c0_61 = arith.constant 0 : index
    %c0_62 = arith.constant 0 : index
    %267 = vector.load %arg5[%c1_60, %c0_61, %c0_62] : memref<2x32x32xf32, #tpu.memory_space<vmem>>, vector<1x32x32xf32>
    %268 = vector.shape_cast %267 : vector<1x32x32xf32> to vector<32x32xf32>
    %cst_63 = arith.constant dense<0.000000e+00> : vector<16x32xf32>
    %269 = tpu.matmul %266, %268, %cst_63 {dimension_numbers = #tpu.dot_dimension_numbers<[1], [0], [0], [1], [0, 0, 1, 1], [], []>} : vector<16x32xf32>, vector<32x32xf32>, vector<16x32xf32> -> vector<16x32xf32>
    %c1_64 = arith.constant 1 : index
    %c0_65 = arith.constant 0 : index
    %c0_66 = arith.constant 0 : index
    %270 = vector.load %arg8[%c1_64, %c0_65, %c0_66] : memref<2x2x32xf32, #tpu.memory_space<vmem>>, vector<1x2x32xf32>
    %271 = vector.shape_cast %270 : vector<1x2x32xf32> to vector<2x32xf32>
    %272 = arith.mulf %269, %269 : vector<16x32xf32>
    %cst_67 = arith.constant dense<0.000000e+00> : vector<16xf32>
    %273 = vector.multi_reduction <add>, %272, %cst_67 [1] : vector<16x32xf32> to vector<16xf32>
    %274 = vector.shape_cast %273 : vector<16xf32> to vector<16x1xf32>
    %cst_68 = arith.constant 3.200000e+01 : f32
    %275 = vector.broadcast %cst_68 : f32 to vector<16x1xf32>
    %276 = arith.divf %274, %275 : vector<16x1xf32>
    %cst_69 = arith.constant 9.99999997E-7 : f32
    %277 = vector.broadcast %cst_69 : f32 to vector<16x1xf32>
    %278 = arith.addf %276, %277 : vector<16x1xf32>
    %279 = math.rsqrt %278 : vector<16x1xf32>
    %280 = vector.broadcast %279 : vector<16x1xf32> to vector<16x32xf32>
    %281 = arith.mulf %269, %280 : vector<16x32xf32>
    %282 = vector.extract_strided_slice %271 {offsets = [0, 0], sizes = [1, 32], strides = [1, 1]} : vector<2x32xf32> to vector<1x32xf32>
    %283 = vector.broadcast %282 : vector<1x32xf32> to vector<16x32xf32>
    %284 = arith.mulf %281, %283 : vector<16x32xf32>
    %285 = arith.addf %210, %284 : vector<16x32xf32>
    %286 = arith.mulf %285, %285 : vector<16x32xf32>
    %cst_70 = arith.constant dense<0.000000e+00> : vector<16xf32>
    %287 = vector.multi_reduction <add>, %286, %cst_70 [1] : vector<16x32xf32> to vector<16xf32>
    %288 = vector.shape_cast %287 : vector<16xf32> to vector<16x1xf32>
    %cst_71 = arith.constant 3.200000e+01 : f32
    %289 = vector.broadcast %cst_71 : f32 to vector<16x1xf32>
    %290 = arith.divf %288, %289 : vector<16x1xf32>
    %cst_72 = arith.constant 9.99999997E-7 : f32
    %291 = vector.broadcast %cst_72 : f32 to vector<16x1xf32>
    %292 = arith.addf %290, %291 : vector<16x1xf32>
    %293 = math.rsqrt %292 : vector<16x1xf32>
    %294 = vector.broadcast %293 : vector<16x1xf32> to vector<16x32xf32>
    %295 = arith.mulf %285, %294 : vector<16x32xf32>
    %c1_73 = arith.constant 1 : index
    %c0_74 = arith.constant 0 : index
    %c0_75 = arith.constant 0 : index
    %296 = vector.load %arg6[%c1_73, %c0_74, %c0_75] : memref<2x32x128xf32, #tpu.memory_space<vmem>>, vector<1x32x128xf32>
    %297 = vector.shape_cast %296 : vector<1x32x128xf32> to vector<32x128xf32>
    %cst_76 = arith.constant dense<0.000000e+00> : vector<16x128xf32>
    %298 = tpu.matmul %295, %297, %cst_76 {dimension_numbers = #tpu.dot_dimension_numbers<[1], [0], [0], [1], [0, 0, 1, 1], [], []>} : vector<16x32xf32>, vector<32x128xf32>, vector<16x128xf32> -> vector<16x128xf32>
    %299 = vector.extract_strided_slice %298 {offsets = [0, 0], sizes = [16, 64], strides = [1, 1]} : vector<16x128xf32> to vector<16x64xf32>
    %300 = arith.mulf %299, %299 : vector<16x64xf32>
    %301 = arith.mulf %299, %300 : vector<16x64xf32>
    %cst_77 = arith.constant 4.471500e-02 : f32
    %302 = vector.broadcast %cst_77 : f32 to vector<16x64xf32>
    %303 = arith.mulf %302, %301 : vector<16x64xf32>
    %304 = arith.addf %299, %303 : vector<16x64xf32>
    %cst_78 = arith.constant 0.797884583 : f32
    %305 = vector.broadcast %cst_78 : f32 to vector<16x64xf32>
    %306 = arith.mulf %305, %304 : vector<16x64xf32>
    %307 = math.tanh %306 : vector<16x64xf32>
    %cst_79 = arith.constant 1.000000e+00 : f32
    %308 = vector.broadcast %cst_79 : f32 to vector<16x64xf32>
    %309 = arith.addf %308, %307 : vector<16x64xf32>
    %cst_80 = arith.constant 5.000000e-01 : f32
    %310 = vector.broadcast %cst_80 : f32 to vector<16x64xf32>
    %311 = arith.mulf %310, %309 : vector<16x64xf32>
    %312 = arith.mulf %299, %311 : vector<16x64xf32>
    %313 = vector.extract_strided_slice %298 {offsets = [0, 64], sizes = [16, 64], strides = [1, 1]} : vector<16x128xf32> to vector<16x64xf32>
    %314 = arith.mulf %312, %313 : vector<16x64xf32>
    %c1_81 = arith.constant 1 : index
    %c0_82 = arith.constant 0 : index
    %c0_83 = arith.constant 0 : index
    %315 = vector.load %arg7[%c1_81, %c0_82, %c0_83] : memref<2x64x32xf32, #tpu.memory_space<vmem>>, vector<1x64x32xf32>
    %316 = vector.shape_cast %315 : vector<1x64x32xf32> to vector<64x32xf32>
    %cst_84 = arith.constant dense<0.000000e+00> : vector<16x32xf32>
    %317 = tpu.matmul %314, %316, %cst_84 {dimension_numbers = #tpu.dot_dimension_numbers<[1], [0], [0], [1], [0, 0, 1, 1], [], []>} : vector<16x64xf32>, vector<64x32xf32>, vector<16x32xf32> -> vector<16x32xf32>
    %318 = arith.mulf %317, %317 : vector<16x32xf32>
    %cst_85 = arith.constant dense<0.000000e+00> : vector<16xf32>
    %319 = vector.multi_reduction <add>, %318, %cst_85 [1] : vector<16x32xf32> to vector<16xf32>
    %320 = vector.shape_cast %319 : vector<16xf32> to vector<16x1xf32>
    %cst_86 = arith.constant 3.200000e+01 : f32
    %321 = vector.broadcast %cst_86 : f32 to vector<16x1xf32>
    %322 = arith.divf %320, %321 : vector<16x1xf32>
    %cst_87 = arith.constant 9.99999997E-7 : f32
    %323 = vector.broadcast %cst_87 : f32 to vector<16x1xf32>
    %324 = arith.addf %322, %323 : vector<16x1xf32>
    %325 = math.rsqrt %324 : vector<16x1xf32>
    %326 = vector.broadcast %325 : vector<16x1xf32> to vector<16x32xf32>
    %327 = arith.mulf %317, %326 : vector<16x32xf32>
    %328 = vector.extract_strided_slice %271 {offsets = [1, 0], sizes = [1, 32], strides = [1, 1]} : vector<2x32xf32> to vector<1x32xf32>
    %329 = vector.broadcast %328 : vector<1x32xf32> to vector<16x32xf32>
    %330 = arith.mulf %327, %329 : vector<16x32xf32>
    %331 = arith.addf %285, %330 : vector<16x32xf32>
    %332 = arith.mulf %331, %331 : vector<16x32xf32>
    %cst_88 = arith.constant dense<0.000000e+00> : vector<16xf32>
    %333 = vector.multi_reduction <add>, %332, %cst_88 [1] : vector<16x32xf32> to vector<16xf32>
    %334 = vector.shape_cast %333 : vector<16xf32> to vector<16x1xf32>
    %cst_89 = arith.constant 3.200000e+01 : f32
    %335 = vector.broadcast %cst_89 : f32 to vector<16x1xf32>
    %336 = arith.divf %334, %335 : vector<16x1xf32>
    %cst_90 = arith.constant 9.99999997E-7 : f32
    %337 = vector.broadcast %cst_90 : f32 to vector<16x1xf32>
    %338 = arith.addf %336, %337 : vector<16x1xf32>
    %339 = math.rsqrt %338 : vector<16x1xf32>
    %340 = vector.broadcast %339 : vector<16x1xf32> to vector<16x32xf32>
    %341 = arith.mulf %331, %340 : vector<16x32xf32>
    %c0_91 = arith.constant 0 : index
    %c0_92 = arith.constant 0 : index
    %342 = vector.load %arg9[%c0_91, %c0_92] : memref<1x32xf32, #tpu.memory_space<vmem>>, vector<1x32xf32>
    %343 = vector.broadcast %342 : vector<1x32xf32> to vector<16x32xf32>
    %344 = arith.mulf %341, %343 : vector<16x32xf32>
    %c0_93 = arith.constant 0 : index
    %c0_94 = arith.constant 0 : index
    %345 = vector.load %arg10[%c0_93, %c0_94] : memref<16x32xf32, #tpu.memory_space<vmem>>, vector<16x32xf32>
    tpu.vector_store %arg10[%c0_93, %c0_94], %344 {strides = array<i32>} : memref<16x32xf32, #tpu.memory_space<vmem>>, vector<16x32xf32>,
    return
  }
}

</mosaic_0001>

<bundles_post_ra>
// kernel: gemma2_like_forward.1
= control target key start
LH: loop header
LB: loop body
LE: loop exit
PB: predicated region body
PF: predicated region fallthrough
CT: control target
= control target key end

     0   :  { %s1967_s16 = smov [#allocation3]   ;;  %s2609_s0 = inlined_call_operand.vmem [shape: s32[16], index: 0, kind: input, shape index: {}]   ;;  %s2610_s1 = inlined_call_operand.vmem [shape: f32[128,32], index: 1, kind: input, shape index: {}]   ;;  %s2611_s2 = inlined_call_operand.vmem [shape: f32[16,32], index: 2, kind: input, shape index: {}]   ;;  %s2612_s3 = inlined_call_operand.vmem [shape: f32[16,32], index: 3, kind: input, shape index: {}]   ;;  %s2613_s4 = inlined_call_operand.vmem [shape: f32[2,32,160], index: 4, kind: input, shape index: {}]   ;;  %s2614_s5 = inlined_call_operand.vmem [shape: f32[2,32,32], index: 5, kind: input, shape index: {}]   ;;  %s2615_s6 = inlined_call_operand.vmem [shape: f32[2,32,128], index: 6, kind: input, shape index: {}]   ;;  %s2616_s7 = inlined_call_operand.vmem [shape: f32[2,64,32], index: 7, kind: input, shape index: {}]   ;;  %s2617_s8 = inlined_call_operand.hbm [shape: f32[2,2,32], index: 8, kind: input, shape index: {}]   ;;  %s2618_s9 = inlined_call_operand.vmem [shape: f32[1,32], index: 9, kind: input, shape index: {}]   ;;  %s2619_s10 = inlined_call_operand.hbm [shape: f32[16,32], index: 10, kind: output, shape index: {}]  }
   0x1   :  { %s16_s15 = sshll.u32 %s2609_s0, 4  ;;  %s17_s15 = int_to_ptr.vmem [resolvable:$true] %s16_s15 }
   0x2   :  { %19 = dma.vmem_to_smem %s17_s15, 16, %s1967_s16, [#allocation2] }
   0x3   :  { %1961 = dma.done.wait [#allocation2], 16 }
   0x4   :  { %1962 = vsyncadd [#allocation2], 4294967280 }
   0x5   :  { %22 = sfence }
   0x6   :  { %23 = vsyncpa [#allocation5], 0 }
   0x7   :  { %24 = vsyncpa [#allocation6], 0  ;;  %s43_s19 = sshll.u32 %s2617_s8, 4  ;;  %s1968_s20 = smov [#allocation4]   ;;  %s44_s19 = int_to_ptr.hbm [resolvable:$true] %s43_s19 }
   0x8   :  { %s45_s21 = sshll.u32 %s1968_s20, 4  ;;  %s1969_s22 = smov 32   ;;  %s46_s21 = int_to_ptr.vmem [resolvable:$true] %s45_s21 }
   0x9   :  { %s1970_s23 = smov 2  }
   0xa   :  { %51 = dma.hbm_to_vmem [thread:$0]  %s44_s19, 64, %s46_s21, [#allocation5], %s1969_s22, %s1969_s22, %s1970_s23  }
   0xb   :  { %1963 = dma.done.wait [#allocation5], 64  }
   0xc   :  { %1964 = vsyncadd [#allocation5], 4294967232  ;;  %s60_s0 = sld [smem:[#allocation3]]  ;;  %v58_v0 = vlaneseq  ;;  %v176_v1 = vld [vmem:[%s2610_s1 + $0x78] sm:$0xff]  ;;  %v175_v2 = vld [vmem:[%s2610_s1 + $0x70] sm:$0xff]  ;;  %vm140_vm2 = vcmask 1040384  }
   0xd   :  { %s1685_s24 = sld [smem:[#allocation3 + $0x1]]  ;;  %177 = vmatpush.msra.mxu0 %v176_v1  ;;  %v174_v4 = vld [vmem:[%s2610_s1 + $0x68] sm:$0xff]  ;;  %v173_v7 = vld [vmem:[%s2610_s1 + $0x60] sm:$0xff]  ;;  %v172_v9 = vld [vmem:[%s2610_s1 + $0x58] sm:$0xff]  ;;  %v1971_v11 = vmov 0.0   ;;  %vm142_vm4 = vcmask 1041408  }
   0xe   :  { %s1687_s25 = sld [smem:[#allocation3 + $0x2]]  ;;  %v2052_v3 = vand.u32 127, %v58_v0  ;;  %v171_v10 = vld [vmem:[%s2610_s1 + $0x50] sm:$0xff]  ;;  %v170_v15 = vld [vmem:[%s2610_s1 + $0x48] sm:$0xff]  ;;  %v169_v21 = vld [vmem:[%s2610_s1 + $0x40] sm:$0xff]  ;;  %vm144_vm6 = vcmask 1042432  }
   0xf   :  { %s2049_s29 = sld [smem:[#allocation3 + $0x3]]  ;;  %178 = vmatpush.msra.mxu0 %v175_v2  ;;  %v168_v23 = vld [vmem:[%s2610_s1 + $0x38] sm:$0xff]  ;;  %vm146_vm10 = vcmask 1043456   ;;  %v167_v27 = vld [vmem:[%s2610_s1 + $0x30] sm:$0xff]  ;;  %v166_v34 = vld [vmem:[%s2610_s1 + $0x28] sm:$0xff]  ;;  %vm148_vm13 = vcmask 1044480  }
  0x10   :  { %s2054_s30 = sld [smem:[#allocation3 + $0x4]]  ;;  %v165_v38 = vld [vmem:[%s2610_s1 + $0x20] sm:$0xff]  ;;  %v164_v42 = vld [vmem:[%s2610_s1 + $0x18] sm:$0xff]  ;;  %v163_v48 = vld [vmem:[%s2610_s1 + $0x10] sm:$0xff]  ;;  %s1974_s11 = smov 64  }
  0x11   :  { %s2059_s13 = sld [smem:[#allocation3 + $0x8]]  ;;  %179 = vmatpush.msra.mxu0 %v174_v4  ;;  %v162_v52 = vld [vmem:[%s2610_s1 + $0x8] sm:$0xff]  ;;  %v161_v55 = vld [vmem:[%s2610_s1] sm:$0xff]  ;;  %s1977_s19 = smov [#allocation7]  }
  0x12   :  { %v61_v5 = vstv %s60_s0  ;;  %s2061_s14 = sld [smem:[#allocation3 + $0x9]]  ;;  %s1979_s23 = smov 8  }
  0x13   :  { %v66_v6 = vstv %s1685_s24  ;;  %vm62_vm0 = vcmp.eq.s32.totalorder %v2052_v3, %v61_v5  ;;  %s2068_s17 = sld [smem:[#allocation3 + $0xa]]  ;;  %180 = vmatpush.msra.mxu0 %v173_v7 }
  0x14   :  { %vm67_vm1 = vcmp.eq.s32.totalorder %v2052_v3, %v66_v6  ;;  %v71_v8 = vstv %s1687_s25  ;;  %s2073_s20 = sld [smem:[#allocation3 + $0x5]]  ;;  %v1684_v12 = vsel %vm62_vm0, 1.0, %v1971_v11 }
  0x15   :  { %v1686_v13 = vsel %vm67_vm1, 1.0, %v1971_v11  ;;  %vm72_vm3 = vcmp.eq.s32.totalorder %v2052_v3, %v71_v8  ;;  %v76_v14 = vstv %s2049_s29  ;;  %s2082_s0 = sld [smem:[#allocation3 + $0xb]]  ;;  %181 = vmatpush.msra.mxu0 %v172_v9  ;;  %v1972_v9 = vmov 32.0  }
  0x16   :  { %s2084_s24 = sld [smem:[#allocation3 + $0x6]]  ;;  %v1688_v18 = vsel %vm72_vm3, 1.0, %v1971_v11  ;;  %vm77_vm5 = vcmp.eq.s32.totalorder %v2052_v3, %v76_v14  ;;  %v81_v19 = vstv %s2054_s30  ;;  %v141_v20 = vsel %vm140_vm2, %v1684_v12, %v1686_v13  ;;  %v255_v12 = vld [vmem:[%s2613_s4 + $0x30] sm:$0xff]  ;;  %v256_v13 = vld [vmem:[%s2613_s4 + $0x38] sm:$0xff] }
  0x17   :  { %v101_v16 = vstv %s2059_s13  ;;  %182 = vmatpush.msra.mxu0 %v171_v10  ;;  %s2095_s27 = sld [smem:[#allocation3 + $0xc]]  ;;  %v1690_v24 = vsel %vm77_vm5, 1.0, %v1971_v11  ;;  %vm82_vm9 = vcmp.eq.s32.totalorder %v2052_v3, %v81_v19  ;;  %v143_v26 = vsel %vm142_vm4, %v141_v20, %v1688_v18  ;;  %275 = vmatpush.msra.mxu1 %v255_v12  ;;  %v251_v18 = vld [vmem:[%s2613_s4 + $0x10] sm:$0xff]  ;;  %v252_v19 = vld [vmem:[%s2613_s4 + $0x18] sm:$0xff] }
  0x18   :  { %v106_v17 = vstv %s2061_s14  ;;  %s2100_s29 = sld [smem:[#allocation3 + $0x7]]  ;;  %vm102_vm7 = vcmp.eq.s32.totalorder %v2052_v3, %v101_v16  ;;  %v1692_v31 = vsel %vm82_vm9, 1.0, %v1971_v11  ;;  %v145_v33 = vsel %vm144_vm6, %v143_v26, %v1690_v24  ;;  %298 = vmatpush.msra.mxu2 %v256_v13  ;;  %v254_v16 = vld [vmem:[%s2613_s4 + $0x28] sm:$0xff] }
  0x19   :  { %183 = vmatpush.msra.mxu0 %v170_v15  ;;  %vm107_vm8 = vcmp.eq.s32.totalorder %v2052_v3, %v106_v17  ;;  %v111_v22 = vstv %s2068_s17  ;;  %s2112_s12 = sld [smem:[#allocation3 + $0xd]]  ;;  %v1700_v28 = vsel %vm102_vm7, 1.0, %v1971_v11  ;;  %v147_v41 = vsel %vm146_vm10, %v145_v33, %v1692_v31  ;;  %v253_v15 = vld [vmem:[%s2613_s4 + $0x20] sm:$0xff]  ;;  %s1973_s17 = smov 96   ;;  %v203_v24 = vld [vmem:[%s2612_s3 + $0x8] sm:$0xff] }
  0x1a   :  { %v86_v25 = vstv %s2073_s20  ;;  %v1702_v29 = vsel %vm107_vm8, 1.0, %v1971_v11  ;;  %vm112_vm11 = vcmp.eq.s32.totalorder %v2052_v3, %v111_v22  ;;  %s2125_s15 = sld [smem:[#allocation3 + $0xe]]  ;;  %vm209_vm7 = vcmask 261120   ;;  %v202_v17 = vld [vmem:[%s2612_s3] sm:$0xff]  ;;  %276 = vmatpush.msra.mxu1 %v253_v15  ;;  %299 = vmatpush.msra.mxu2 %v254_v16  ;;  %v250_v22 = vld [vmem:[%s2613_s4 + $0x8] sm:$0xff] }
  0x1b   :  { %184 = vmatpush.msra.mxu0 %v169_v21  ;;  %v116_v30 = vstv %s2082_s0  ;;  %vm87_vm12 = vcmp.eq.s32.totalorder %v2052_v3, %v86_v25  ;;  %v1704_v35 = vsel %vm112_vm11, 1.0, %v1971_v11  ;;  %v154_v37 = vsel %vm140_vm2, %v1700_v28, %v1702_v29  ;;  %s2141_s20 = sld [smem:[#allocation3 + $0xf]]  ;;  %341 = vrot.lane.b32.xlu1 %v202_v17, %s1973_s17  ;;  %v249_v21 = vld [vmem:[%s2613_s4] sm:$0xff]  ;;  %v2233_v29 = vld [vmem:[%s2611_s2 + $0x8] sm:$0xff] }
  0x1c   :  { %v91_v32 = vstv %s2084_s24  ;;  %vm117_vm14 = vcmp.eq.s32.totalorder %v2052_v3, %v116_v30  ;;  %v1694_v39 = vsel %vm87_vm12, 1.0, %v1971_v11  ;;  %v155_v45 = vsel %vm142_vm4, %v154_v37, %v1704_v35  ;;  %277 = vmatpush.msra.mxu1 %v251_v18  ;;  %300 = vmatpush.msra.mxu2 %v252_v19  ;;  %v2228_v28 = vld [vmem:[%s2611_s2] sm:$0xff]  ;;  %s1975_s2 = smov 112  }
  0x1d   :  { %185 = vmatpush.msra.mxu0 %v168_v23  ;;  %v121_v36 = vstv %s2095_s27  ;;  %vm92_vm15 = vcmp.eq.s32.totalorder %v2052_v3, %v91_v32  ;;  %v1706_v43 = vsel %vm117_vm14, 1.0, %v1971_v11  ;;  %v149_v47 = vsel %vm148_vm13, %v147_v41, %v1694_v39  ;;  %333 = vrot.lane.b32.xlu2 %v2228_v28, %s1974_s11 }
  0x1e   :  { %v96_v40 = vstv %s2100_s29  ;;  %vm122_vm0 = vcmp.eq.s32.totalorder %v2052_v3, %v121_v36  ;;  %v1696_v46 = vsel %vm92_vm15, 1.0, %v1971_v11  ;;  %vm150_vm2 = vcmask 1045504   ;;  %278 = vmatpush.msra.mxu1 %v249_v21  ;;  %301 = vmatpush.msra.mxu2 %v250_v22 }
  0x1f   :  { %186 = vmatpush.msra.mxu0 %v167_v27  ;;  %v126_v44 = vstv %s2112_s12  ;;  %vm97_vm1 = vcmp.eq.s32.totalorder %v2052_v3, %v96_v40  ;;  %v1708_v49 = vsel %vm122_vm0, 1.0, %v1971_v11  ;;  %v156_v51 = vsel %vm144_vm6, %v155_v45, %v1706_v43 }
  0x20   :  { %vm127_vm3 = vcmp.eq.s32.totalorder %v2052_v3, %v126_v44  ;;  %v131_v50 = vstv %s2125_s15  ;;  %v1698_v53 = vsel %vm97_vm1, 1.0, %v1971_v11  ;;  %v151_v54 = vsel %vm150_vm2, %v149_v47, %v1696_v46  ;;  %s1976_s15 = smov 16  }
  0x21   :  { %187 = vmatpush.msra.mxu0 %v166_v34  ;;  %vm152_vm4 = vcmask 1046528   ;;  %v1710_v56 = vsel %vm127_vm3, 1.0, %v1971_v11  ;;  %vm132_vm5 = vcmp.eq.s32.totalorder %v2052_v3, %v131_v50  ;;  %v136_v57 = vstv %s2141_s20  ;;  %s1669_s20 = sshll.u32 %s1977_s19, 4  ;;  %s1670_s20 = int_to_ptr.vmem [resolvable:$true] %s1669_s20 }
  0x22   :  { %v157_v58 = vsel %vm146_vm10, %v156_v51, %v1708_v49  ;;  %v153_v59 = vsel %vm152_vm4, %v151_v54, %v1698_v53  ;;  %v1712_v60 = vsel %vm132_vm5, 1.0, %v1971_v11  ;;  %vm137_vm6 = vcmp.eq.s32.totalorder %v2052_v3, %v136_v57 }
  0x23   :  { %188 = vmatpush.msra.mxu0 %v165_v38  ;;  %v158_v61 = vsel %vm148_vm13, %v157_v58, %v1710_v56  ;;  %v1714_v62 = vsel %vm137_vm6, 1.0, %v1971_v11  ;;  %1807 = vrcp.f32 %v1972_v9  ;;  %343 = vrot.lane.b32.xlu1 %v203_v24, %s1973_s17  ;;  %vm381_vm15 = vcmask 130048  }
  0x24   :  { %v159_v63 = vsel %vm150_vm2, %v158_v61, %v1712_v60  ;;  %vm510_vm1 = vcmask 64512  }
  0x25   :  { %189 = vmatpush.msra.mxu0 %v164_v42  ;;  %v160_v1 = vsel %vm152_vm4, %v159_v63, %v1714_v62 }
  0x27   :  { %190 = vmatpush.msra.mxu0 %v163_v48 }
  0x29   :  { %191 = vmatpush.msra.mxu0 %v162_v52  ;;  %v1808_v10 = vpop.eup %1807 }
  0x2a   :  { %v217_v11 = vmul.f32 32.0, %v1808_v10  ;;  %vm221_vm8 = vweird.f32 %v1808_v10 }
  0x2b   :  { %192 = vmatpush.msra.mxu0 %v161_v55  ;;  %335 = vrot.lane.b32.xlu1 %v2233_v29, %s1974_s11 }
  0x2c   :  { %193 = vmatmul.f32.vlgmr.msra.gmra.mxu0 %v153_v59  ;;  %v218_v14 = vsub.f32 1.0, %v217_v11 }
  0x2e   :  { %v219_v20 = vmul.f32 %v1808_v10, %v218_v14 }
  0x30   :  { %v220_v23 = vadd.f32 %v1808_v10, %v219_v20 }
  0x32   :  { %v2222_v25 = vsel %vm221_vm8, %v1808_v10, %v220_v23 }
  0x33   :  { %315 = vrot.lane.b32.xlu1 %v203_v24, %s1969_s22 }
  0x34   :  { %196 = vmatmul.f32.gmra.mxu0 %v160_v1 }
  0x77   :  { %v2268_v62 = vpop.permute.xlu2 %333 }
  0x8d   :  { %v2247_v50 = vpop.permute.xlu1 %341 }
  0x95   :  { %v2249_v51 = vpop.permute.xlu1 %343 }
  0x9d   :  { %v2251_v52 = vpop.permute.xlu1 %335 }
  0xa5   :  { %v2261_v58 = vpop.permute.xlu1 %315 }
  0xa9   :  { %v2179_v2 = vpop.f32.mrf.mxu0 }
  0xaa   :  { %v207_v4 = vmul.f32 %v2179_v2, %v2179_v2 }
  0xac   :  { %v210_v5 = vsel %vm209_vm7, %v207_v4, 0.0 }
  0xad   :  { %211 = vadd.xlane.f32.xlu0 %v210_v5 }
  0xb1   :  { %v2184_v6 = vpop.f32.mrf.mxu0 }
  0xb2   :  { %v208_v7 = vmul.f32 %v2184_v6, %v2184_v6 }
  0xb4   :  { %v213_v8 = vsel %vm209_vm7, %v208_v7, 0.0 }
  0xb5   :  { %214 = vadd.xlane.f32.xlu0 %v213_v8 }
  0xc9   :  { %313 = vrot.lane.b32.xlu0 %v202_v17, %s1969_s22 }
 0x120   :  { %v212_v26 = vpop.xlane.xlu0 %211 }
 0x121   :  { %v223_v27 = vmul.f32 %v2222_v25, %v212_v26 }
 0x123   :  { %v225_v30 = vadd.f32 1e-06, %v223_v27  ;;  %v205_v27 = vshrl.u32 %v58_v0, 7 }
 0x125   :  { %1809 = vrsqrt.f32 %v225_v30  ;;  %vm233_vm10 = vweird.f32 %v225_v30  ;;  %vm2292_vm0 = vcmp.le.s32.totalorder %v2052_v3, %v205_v27 }
 0x128   :  { %v215_v31 = vpop.xlane.xlu0 %214 }
 0x129   :  { %v224_v32 = vmul.f32 %v2222_v25, %v215_v31 }
 0x12b   :  { %v1810_v33 = vpop.eup %1809  ;;  %v226_v34 = vadd.f32 1e-06, %v224_v32 }
 0x12c   :  { %v228_v35 = vmul.f32 %v1810_v33, %v225_v30  ;;  %vm234_vm9 = vweird.f32 %v1810_v33 }
 0x12d   :  { %1811 = vrsqrt.f32 %v226_v34  ;;  %vm235_vm11 = vmor %vm233_vm10, %vm234_vm9  ;;  %vm243_vm12 = vweird.f32 %v226_v34 }
 0x12e   :  { %v229_v36 = vmul.f32 %v1810_v33, %v228_v35 }
 0x130   :  { %v230_v37 = vmul.f32 0.5, %v229_v36 }
 0x132   :  { %v231_v38 = vsub.f32 1.5, %v230_v37 }
 0x133   :  { %v1812_v39 = vpop.eup %1811 }
 0x134   :  { %v238_v40 = vmul.f32 %v1812_v39, %v226_v34  ;;  %v232_v41 = vmul.f32 %v1810_v33, %v231_v38  ;;  %vm244_vm13 = vweird.f32 %v1812_v39 }
 0x135   :  { %vm245_vm14 = vmor %vm243_vm12, %vm244_vm13 }
 0x136   :  { %v239_v42 = vmul.f32 %v1812_v39, %v238_v40  ;;  %v236_v43 = vsel %vm235_vm11, %v1810_v33, %v232_v41 }
 0x137   :  { %v247_v44 = vmul.f32 %v236_v43, %v2179_v2 }
 0x138   :  { %v240_v45 = vmul.f32 0.5, %v239_v42 }
 0x139   :  { %1715 = vmatmul.msk.f32.vlgmr.msra.gmra.mxu1 %vm209_vm7, %v247_v44  ;;  %1717 = vmatmul.msk.f32.vlgmr.msra.gmra.mxu2 %vm209_vm7, %v247_v44 }
 0x13a   :  { %v241_v46 = vsub.f32 1.5, %v240_v45 }
 0x13b   :  { %v2253_v53 = vpop.permute.xlu0 %313 }
 0x13c   :  { %v242_v47 = vmul.f32 %v1812_v39, %v241_v46 }
 0x13e   :  { %v246_v48 = vsel %vm245_vm14, %v1812_v39, %v242_v47 }
 0x13f   :  { %v248_v49 = vmul.f32 %v246_v48, %v2184_v6 }
 0x141   :  { %1716 = vmatmul.msk.f32.gmra.mxu1 %vm209_vm7, %v248_v49  ;;  %1718 = vmatmul.msk.f32.gmra.mxu2 %vm209_vm7, %v248_v49 }
 0x1b6   :  { %v280_v54 = vpop.f32.mrf.mxu1 }
 0x1b7   :  { %v319_v55 = vmul.f32 %v2253_v53, %v280_v54  ;;  %v347_v56 = vmul.f32 %v2247_v50, %v280_v54  ;;  %v339_v63 = vmul.f32 %v2268_v62, %v280_v54  ;;  %v309_v9 = vmul.f32 %v280_v54, %v2228_v28 }
 0x1b9   :  { %351 = vrot.lane.b32.xlu2 %v347_v56, %s1973_s17  ;;  %323 = vrot.lane.b32.xlu1 %v319_v55, %s1973_s17 }
 0x1bc   :  { %v2259_v57 = vpop.f32.mrf.mxu2 }
 0x1bd   :  { %601 = vmatpush.msrb.mxu2 %v2259_v57 }
 0x1be   :  { %v283_v59 = vpop.f32.mrf.mxu1 }
 0x1bf   :  { %v348_v60 = vmul.f32 %v2249_v51, %v283_v59  ;;  %v320_v61 = vmul.f32 %v2261_v58, %v283_v59  ;;  %v340_v5 = vmul.f32 %v2251_v52, %v283_v59  ;;  %v310_v14 = vmul.f32 %v283_v59, %v2233_v29 }
 0x1c1   :  { %353 = vrot.lane.b32.xlu2 %v348_v60, %s1973_s17  ;;  %325 = vrot.lane.b32.xlu0 %v320_v61, %s1973_s17 }
 0x1c4   :  { %v306_v21 = vpop.f32.mrf.mxu2 }
 0x213   :  { %v352_v1 = vpop.permute.xlu2 %351 }
 0x214   :  { %v357_v4 = vadd.f32 %v352_v1, %v339_v63 }
 0x216   :  { %367 = vrot.lane.b32.xlu2 %v357_v4, %s1975_s2  ;;  %379 = vrot.lane.b32.xlu1 %v357_v4, %s1974_s11 }
 0x21b   :  { %v354_v7 = vpop.permute.xlu2 %353 }
 0x21c   :  { %v358_v8 = vadd.f32 %v354_v7, %v340_v5  ;;  %v1796_v5 = vpack.i.bf16 %v306_v21, %v2259_v57 }
 0x21e   :  { %369 = vrot.lane.b32.xlu2 %v358_v8, %s1975_s2 }
 0x226   :  { %406 = vrot.lane.b32.xlu2 %v358_v8, %s1974_s11 }
 0x22b   :  { %v324_v10 = vpop.permute.xlu1 %323 }
 0x22c   :  { %v329_v11 = vadd.f32 %v324_v10, %v309_v9 }
 0x22e   :  { %361 = vrot.lane.b32.xlu1 %v329_v11, %s1975_s2 }
 0x233   :  { %v326_v13 = vpop.permute.xlu0 %325 }
 0x234   :  { %v330_v15 = vadd.f32 %v326_v13, %v310_v14 }
 0x270   :  { %v368_v12 = vpop.permute.xlu2 %367 }
 0x271   :  { %432 = vrot.lane.b32.xlu0 %v368_v12, %s1974_s11 }
 0x278   :  { %v370_v16 = vpop.permute.xlu2 %369 }
 0x279   :  { %458 = vrot.lane.b32.xlu2 %v370_v16, %s1974_s11  ;;  %363 = vrot.lane.b32.xlu0 %v330_v15, %s1975_s2 }
 0x280   :  { %v407_v18 = vpop.permute.xlu2 %406 }
 0x288   :  { %v380_v17 = vpop.permute.xlu1 %379 }
 0x289   :  { %1719 = vmatpush.xpose.msk.msra.mxu3 %vm381_vm15, %v380_v17 }
 0x28c   :  { %1720 = vmatmul.msk.f32.vlgmr.msra.gmra.mxu3 %vm381_vm15, %v329_v11 }
 0x28d   :  { %1721 = vmatpush.xpose.msk.msrb.mxu3 %vm381_vm15, %v407_v18 }
 0x294   :  { %1722 = vmatmul.msk.f32.vlgmr.msrb.gmra.mxu3 %vm381_vm15, %v330_v15 }
 0x2a0   :  { %v362_v22 = vpop.permute.xlu1 %361 }
 0x2d3   :  { %v459_v19 = vpop.permute.xlu2 %458 }
 0x2d4   :  { %1725 = vmatpush.xpose.msk.msrb.mxu1 %vm381_vm15, %v459_v19 }
 0x2e3   :  { %v433_v20 = vpop.permute.xlu0 %432 }
 0x2e4   :  { %1723 = vmatpush.xpose.msk.msra.mxu3 %vm381_vm15, %v433_v20 }
 0x2e7   :  { %1724 = vmatmul.msk.f32.vlgmr.msra.gmra.mxu3 %vm381_vm15, %v362_v22 }
 0x2e8   :  { %624 = vmatpush.msrb.mxu3 %v306_v21 }
 0x2eb   :  { %v364_v23 = vpop.permute.xlu0 %363 }
 0x2ec   :  { %1726 = vmatmul.msk.f32.vlgmr.msrb.gmra.mxu1 %vm381_vm15, %v364_v23 }
 0x30f   :  { %v403_v24 = vpop.f32.mrf.mxu3 }
 0x310   :  { %v484_v26 = vmul.f32 0.005, %v403_v24 }
 0x312   :  { %1813 = vtanh.f32 %v484_v26 }
 0x317   :  { %v429_v30 = vpop.f32.mrf.mxu3 }
 0x318   :  { %v1814_v31 = vpop.eup %1813  ;;  %v485_v33 = vmul.f32 0.005, %v429_v30 }
 0x319   :  { %v492_v34 = vmul.f32 50.0, %v1814_v31 }
 0x31a   :  { %1815 = vtanh.f32 %v485_v33 }
 0x31b   :  { %v498_v35 = vsel %vm2292_vm0, %v492_v34, -1e+30 }
 0x31c   :  { %v502_v36 = vmul.f32 1.442695, %v498_v35 }
 0x31e   :  { %1817 = vpow2.f32 %v502_v36 }
 0x320   :  { %v1816_v37 = vpop.eup %1815 }
 0x321   :  { %v493_v38 = vmul.f32 50.0, %v1816_v37 }
 0x323   :  { %v499_v0 = vsel %vm2292_vm0, %v493_v38, -1e+30 }
 0x324   :  { %v1818_v39 = vpop.eup %1817  ;;  %v504_v40 = vmul.f32 1.442695, %v499_v0 }
 0x325   :  { %v511_v3 = vsel %vm510_vm1, %v1818_v39, 0.0 }
 0x326   :  { %1819 = vpow2.f32 %v504_v40  ;;  %512 = vadd.xlane.f32.xlu1 %v511_v3 }
 0x32c   :  { %v1820_v41 = vpop.eup %1819 }
 0x32d   :  { %v514_v42 = vsel %vm510_vm1, %v1820_v41, 0.0 }
 0x32e   :  { %515 = vadd.xlane.f32.xlu1 %v514_v42 }
 0x369   :  { %v481_v43 = vpop.f32.mrf.mxu1 }
 0x36a   :  { %v487_v44 = vmul.f32 0.005, %v481_v43  ;;  %v455_v45 = vpop.f32.mrf.mxu3 }
 0x36b   :  { %v486_v46 = vmul.f32 0.005, %v455_v45 }
 0x36c   :  { %1821 = vtanh.f32 %v487_v44 }
 0x36d   :  { %1823 = vtanh.f32 %v486_v46 }
 0x372   :  { %v1822_v47 = vpop.eup %1821 }
 0x373   :  { %v1824_v48 = vpop.eup %1823  ;;  %v495_v49 = vmul.f32 50.0, %v1822_v47 }
 0x374   :  { %v494_v54 = vmul.f32 50.0, %v1824_v48 }
 0x375   :  { %v501_v55 = vsel %vm2292_vm0, %v495_v49, -1e+30 }
 0x376   :  { %v508_v56 = vmul.f32 1.442695, %v501_v55  ;;  %v500_v59 = vsel %vm2292_vm0, %v494_v54, -1e+30 }
 0x377   :  { %v506_v60 = vmul.f32 1.442695, %v500_v59 }
 0x378   :  { %1825 = vpow2.f32 %v508_v56 }
 0x379   :  { %1827 = vpow2.f32 %v506_v60 }
 0x37e   :  { %v2306_v61 = vpop.eup %1825 }
 0x37f   :  { %v2308_v63 = vpop.eup %1827  ;;  %v520_v1 = vsel %vm510_vm1, %v2306_v61, 0.0 }
 0x380   :  { %521 = vadd.xlane.f32.xlu0 %v520_v1  ;;  %v517_v4 = vsel %vm510_vm1, %v2308_v63, 0.0 }
 0x381   :  { %518 = vadd.xlane.f32.xlu2 %v517_v4 }
 0x399   :  { %v513_v7 = vpop.xlane.xlu1 %512  ;;  %1797 = vrot.lane.b32.xlu2 %v1796_v5, %s1975_s2 }
 0x39a   :  { %1829 = vrcp.f32 %v513_v7  ;;  %v534_v12 = vand.u32 2147483648, %v513_v7  ;;  %v532_v14 = vand.u32 2147483647, %v513_v7  ;;  %vm528_vm3 = vweird.f32 %v513_v7 }
 0x39c   :  { %v535_v17 = vor.u32 1.1754944e-38, %v534_v12  ;;  %vm533_vm5 = vcmp.eq.f32.partialorder %v532_v14, 8.507059e+37  ;;  %v685_v12 = vld [vmem:[%s2614_s5] sm:$0xff] }
 0x3a0   :  { %v1830_v8 = vpop.eup %1829 }
 0x3a1   :  { %v524_v9 = vmul.f32 %v1830_v8, %v513_v7  ;;  %v516_v10 = vpop.xlane.xlu1 %515  ;;  %vm529_vm2 = vweird.f32 %v1830_v8 }
 0x3a2   :  { %1831 = vrcp.f32 %v516_v10  ;;  %vm530_vm4 = vmor %vm528_vm3, %vm529_vm2  ;;  %v549_v22 = vand.u32 2147483648, %v516_v10  ;;  %v547_v24 = vand.u32 2147483647, %v516_v10  ;;  %vm543_vm8 = vweird.f32 %v516_v10 }
 0x3a3   :  { %v525_v11 = vsub.f32 1.0, %v524_v9  ;;  %v687_v9 = vld [vmem:[%s2614_s5 + $0x10] sm:$0xff] }
 0x3a4   :  { %v550_v27 = vor.u32 1.1754944e-38, %v549_v22  ;;  %vm548_vm10 = vcmp.eq.f32.partialorder %v547_v24, 8.507059e+37 }
 0x3a5   :  { %v526_v13 = vmul.f32 %v1830_v8, %v525_v11 }
 0x3a7   :  { %v527_v15 = vadd.f32 %v1830_v8, %v526_v13 }
 0x3a8   :  { %v1832_v16 = vpop.eup %1831 }
 0x3a9   :  { %v539_v57 = vmul.f32 %v1832_v16, %v516_v10  ;;  %v531_v18 = vsel %vm530_vm4, %v1830_v8, %v527_v15  ;;  %vm544_vm6 = vweird.f32 %v1832_v16  ;;  %v688_v8 = vld [vmem:[%s2614_s5 + $0x18] sm:$0xff]  ;;  %v686_v10 = vld [vmem:[%s2614_s5 + $0x8] sm:$0xff] }
 0x3aa   :  { %v536_v19 = vsel %vm533_vm5, %v535_v17, %v531_v18  ;;  %vm545_vm9 = vmor %vm543_vm8, %vm544_vm6  ;;  %707 = vmatpush.msra.mxu3 %v688_v8 }
 0x3ab   :  { %v540_v20 = vsub.f32 1.0, %v539_v57  ;;  %v537_v21 = vmul.f32 %v1818_v39, %v536_v19 }
 0x3ac   :  { %708 = vmatpush.msra.mxu3 %v687_v9 }
 0x3ad   :  { %v541_v23 = vmul.f32 %v1832_v16, %v540_v20  ;;  %1727 = vmatmul.msk.f32.vlgmr.msrb.gmra.mxu2 %vm510_vm1, %v537_v21 }
 0x3ae   :  { %709 = vmatpush.msra.mxu3 %v686_v10 }
 0x3af   :  { %v542_v26 = vadd.f32 %v1832_v16, %v541_v23 }
 0x3b0   :  { %710 = vmatpush.msra.mxu3 %v685_v12 }
 0x3b1   :  { %v546_v30 = vsel %vm545_vm9, %v1832_v16, %v542_v26 }
 0x3b2   :  { %v551_v31 = vsel %vm548_vm10, %v550_v27, %v546_v30 }
 0x3b3   :  { %v552_v33 = vmul.f32 %v1820_v41, %v551_v31 }
 0x3b5   :  { %1728 = vmatmul.msk.f32.vlgmr.msrb.gmra.mxu3 %vm510_vm1, %v552_v33 }
 0x3f3   :  { %v522_v34 = vpop.xlane.xlu0 %521 }
 0x3f4   :  { %1833 = vrcp.f32 %v522_v34  ;;  %v519_v35 = vpop.xlane.xlu2 %518  ;;  %v579_v43 = vand.u32 2147483648, %v522_v34  ;;  %v577_v46 = vand.u32 2147483647, %v522_v34  ;;  %vm573_vm13 = vweird.f32 %v522_v34 }
 0x3f5   :  { %1835 = vrcp.f32 %v519_v35  ;;  %v564_v41 = vand.u32 2147483648, %v519_v35  ;;  %v562_v48 = vand.u32 2147483647, %v519_v35  ;;  %vm558_vm2 = vweird.f32 %v519_v35 }
 0x3f6   :  { %v580_v54 = vor.u32 1.1754944e-38, %v579_v43  ;;  %vm578_vm3 = vcmp.eq.f32.partialorder %v577_v46, 8.507059e+37 }
 0x3f7   :  { %v565_v59 = vor.u32 1.1754944e-38, %v564_v41  ;;  %vm563_vm5 = vcmp.eq.f32.partialorder %v562_v48, 8.507059e+37 }
 0x3fa   :  { %v1834_v36 = vpop.eup %1833 }
 0x3fb   :  { %v1836_v37 = vpop.eup %1835  ;;  %v569_v38 = vmul.f32 %v1834_v36, %v522_v34  ;;  %vm574_vm11 = vweird.f32 %v1834_v36 }
 0x3fc   :  { %v554_v0 = vmul.f32 %v1836_v37, %v519_v35  ;;  %v1798_v39 = vpop.permute.xlu2 %1797  ;;  %vm559_vm12 = vweird.f32 %v1836_v37  ;;  %vm575_vm14 = vmor %vm573_vm13, %vm574_vm11 }
 0x3fd   :  { %v570_v40 = vsub.f32 1.0, %v569_v38  ;;  %v1800_v3 = vunpack.i.h.bf16 %v1798_v39  ;;  %v1799_v42 = vunpack.i.l.bf16 %v1798_v39  ;;  %vm560_vm4 = vmor %vm558_vm2, %vm559_vm12  ;;  %v2344_v38 = vld [vmem:[#allocation4] sm:$0x3] }
 0x3fe   :  { %v555_v44 = vsub.f32 1.0, %v554_v0 }
 0x3ff   :  { %v571_v45 = vmul.f32 %v1834_v36, %v570_v40  ;;  %647 = vmatpush.msra.mxu1 %v1799_v42  ;;  %670 = vmatpush.msra.mxu2 %v1800_v3  ;;  %v753_v3 = vperm.slane %v2344_v38, 0 }
 0x400   :  { %v556_v47 = vmul.f32 %v1836_v37, %v555_v44 }
 0x401   :  { %v572_v49 = vadd.f32 %v1834_v36, %v571_v45 }
 0x402   :  { %v557_v55 = vadd.f32 %v1836_v37, %v556_v47 }
 0x403   :  { %v576_v56 = vsel %vm575_vm14, %v1834_v36, %v572_v49 }
 0x404   :  { %v581_v60 = vsel %vm578_vm3, %v580_v54, %v576_v56  ;;  %v561_v1 = vsel %vm560_vm4, %v1836_v37, %v557_v55 }
 0x405   :  { %v566_v4 = vsel %vm563_vm5, %v565_v59, %v561_v1  ;;  %v582_v5 = vmul.f32 %v2306_v61, %v581_v60 }
 0x406   :  { %v567_v7 = vmul.f32 %v2308_v63, %v566_v4  ;;  %v795_v4 = vld [vmem:[%s2615_s6 + $0x18] sm:$0xff] }
 0x407   :  { %1730 = vmatmul.msk.f32.vlgmr.msra.gmra.mxu2 %vm510_vm1, %v582_v5  ;;  %814 = vmatpush.msrb.mxu1 %v795_v4  ;;  %v794_v5 = vld [vmem:[%s2615_s6 + $0x10] sm:$0xff] }
 0x408   :  { %1729 = vmatmul.msk.f32.vlgmr.msra.gmra.mxu1 %vm510_vm1, %v567_v7  ;;  %v792_v7 = vld [vmem:[%s2615_s6] sm:$0xff] }
 0x409   :  { %815 = vmatpush.msrb.mxu1 %v794_v5 }
 0x430   :  { %v603_v61 = vpop.f32.mrf.mxu2 }
 0x438   :  { %v626_v16 = vpop.f32.mrf.mxu3 }
 0x485   :  { %v649_v63 = vpop.f32.mrf.mxu1 }
 0x486   :  { %677 = vrot.lane.b32.xlu0 %v649_v63, %s1976_s15 }
 0x48a   :  { %v672_v11 = vpop.f32.mrf.mxu2 }
 0x48b   :  { %679 = vrot.lane.b32.xlu1 %v672_v11, %s1976_s15 }
 0x4f8   :  { %v678_v13 = vpop.permute.xlu0 %677 }
 0x4f9   :  { %v683_v14 = vsel %vm381_vm15, %v603_v61, %v678_v13 }
 0x4fa   :  { %1731 = vmatmul.msk.f32.vlgmr.msra.gmra.mxu3 %vm209_vm7, %v683_v14 }
 0x4fd   :  { %v680_v15 = vpop.permute.xlu1 %679 }
 0x4fe   :  { %v684_v17 = vsel %vm381_vm15, %v626_v16, %v680_v15 }
 0x502   :  { %1732 = vmatmul.msk.f32.gmra.mxu3 %vm209_vm7, %v684_v17 }
 0x57d   :  { %v712_v57 = vpop.f32.mrf.mxu3 }
 0x57e   :  { %v719_v18 = vmul.f32 %v712_v57, %v712_v57 }
 0x580   :  { %v721_v19 = vsel %vm209_vm7, %v719_v18, 0.0 }
 0x581   :  { %722 = vadd.xlane.f32.xlu2 %v721_v19 }
 0x585   :  { %v715_v20 = vpop.f32.mrf.mxu3 }
 0x586   :  { %v720_v21 = vmul.f32 %v715_v20, %v715_v20 }
 0x588   :  { %v724_v22 = vsel %vm209_vm7, %v720_v21, 0.0 }
 0x589   :  { %725 = vadd.xlane.f32.xlu0 %v724_v22 }
 0x5f4   :  { %v723_v23 = vpop.xlane.xlu2 %722 }
 0x5f5   :  { %v727_v24 = vmul.f32 %v723_v23, %v2222_v25 }
 0x5f7   :  { %v729_v26 = vadd.f32 1e-06, %v727_v24 }
 0x5f9   :  { %1837 = vrsqrt.f32 %v729_v26  ;;  %vm737_vm8 = vweird.f32 %v729_v26 }
 0x5fc   :  { %v726_v27 = vpop.xlane.xlu0 %725 }
 0x5fd   :  { %v728_v30 = vmul.f32 %v726_v27, %v2222_v25 }
 0x5ff   :  { %v1838_v31 = vpop.eup %1837  ;;  %v730_v33 = vadd.f32 1e-06, %v728_v30 }
 0x600   :  { %v732_v34 = vmul.f32 %v1838_v31, %v729_v26  ;;  %vm738_vm6 = vweird.f32 %v1838_v31 }
 0x601   :  { %1839 = vrsqrt.f32 %v730_v33  ;;  %vm739_vm9 = vmor %vm737_vm8, %vm738_vm6  ;;  %vm747_vm11 = vweird.f32 %v730_v33  ;;  %vm861_vm6 = vcmask 523264  }
 0x602   :  { %v733_v35 = vmul.f32 %v1838_v31, %v732_v34  ;;  %v859_v34 = vld [vmem:[%s2616_s7 + $0x30] sm:$0xff] }
 0x604   :  { %v734_v36 = vmul.f32 0.5, %v733_v35  ;;  %v858_v35 = vld [vmem:[%s2616_s7 + $0x28] sm:$0xff] }
 0x606   :  { %v735_v37 = vsub.f32 1.5, %v734_v36  ;;  %v857_v36 = vld [vmem:[%s2616_s7 + $0x20] sm:$0xff] }
 0x607   :  { %v1840_v0 = vpop.eup %1839 }
 0x608   :  { %v736_v39 = vmul.f32 %v1838_v31, %v735_v37  ;;  %v742_v40 = vmul.f32 %v1840_v0, %v730_v33  ;;  %vm748_vm10 = vweird.f32 %v1840_v0  ;;  %v860_v33 = vld [vmem:[%s2616_s7 + $0x38] sm:$0xff] }
 0x609   :  { %vm749_vm12 = vmor %vm747_vm11, %vm748_vm10  ;;  %v856_v37 = vld [vmem:[%s2616_s7 + $0x18] sm:$0xff] }
 0x60a   :  { %v740_v42 = vsel %vm739_vm9, %v1838_v31, %v736_v39  ;;  %v743_v43 = vmul.f32 %v1840_v0, %v742_v40  ;;  %v854_v40 = vld [vmem:[%s2616_s7 + $0x8] sm:$0xff] }
 0x60b   :  { %v751_v44 = vmul.f32 %v740_v42, %v712_v57  ;;  %v853_v42 = vld [vmem:[%s2616_s7] sm:$0xff] }
 0x60c   :  { %v744_v45 = vmul.f32 0.5, %v743_v43 }
 0x60d   :  { %v754_v46 = vmul.f32 %v753_v3, %v751_v44 }
 0x60e   :  { %v745_v41 = vsub.f32 1.5, %v744_v45 }
 0x60f   :  { %v2348_v47 = vadd.f32 %v754_v46, %v2179_v2 }
 0x610   :  { %v746_v48 = vmul.f32 %v1840_v0, %v745_v41 }
 0x611   :  { %v758_v49 = vmul.f32 %v2348_v47, %v2348_v47 }
 0x612   :  { %v750_v54 = vsel %vm749_vm12, %v1840_v0, %v746_v48  ;;  %v855_v0 = vld [vmem:[%s2616_s7 + $0x10] sm:$0xff] }
 0x613   :  { %v752_v55 = vmul.f32 %v750_v54, %v715_v20  ;;  %v760_v56 = vsel %vm209_vm7, %v758_v49, 0.0 }
 0x614   :  { %761 = vadd.xlane.f32.xlu1 %v760_v56 }
 0x615   :  { %v755_v59 = vmul.f32 %v753_v3, %v752_v55 }
 0x617   :  { %v2354_v60 = vadd.f32 %v755_v59, %v2184_v6  ;;  %v793_v6 = vld [vmem:[%s2615_s6 + $0x8] sm:$0xff] }
 0x618   :  { %816 = vmatpush.msrb.mxu1 %v793_v6 }
 0x619   :  { %v759_v1 = vmul.f32 %v2354_v60, %v2354_v60 }
 0x61a   :  { %817 = vmatpush.msrb.mxu1 %v792_v7 }
 0x61b   :  { %v763_v2 = vsel %vm209_vm7, %v759_v1, 0.0 }
 0x61c   :  { %764 = vadd.xlane.f32.xlu2 %v763_v2  ;;  %876 = vmatpush.msra.mxu1 %v860_v33 }
 0x61e   :  { %877 = vmatpush.msra.mxu1 %v859_v34 }
 0x620   :  { %878 = vmatpush.msra.mxu1 %v858_v35 }
 0x622   :  { %879 = vmatpush.msra.mxu1 %v857_v36 }
 0x624   :  { %880 = vmatpush.msra.mxu1 %v856_v37 }
 0x626   :  { %881 = vmatpush.msra.mxu1 %v855_v0 }
 0x628   :  { %882 = vmatpush.msra.mxu1 %v854_v40 }
 0x62a   :  { %883 = vmatpush.msra.mxu1 %v853_v42 }
 0x687   :  { %v762_v8 = vpop.xlane.xlu1 %761 }
 0x688   :  { %v766_v9 = vmul.f32 %v762_v8, %v2222_v25 }
 0x68a   :  { %v768_v10 = vadd.f32 1e-06, %v766_v9 }
 0x68c   :  { %1841 = vrsqrt.f32 %v768_v10  ;;  %vm776_vm14 = vweird.f32 %v768_v10 }
 0x68f   :  { %v765_v61 = vpop.xlane.xlu2 %764 }
 0x690   :  { %v767_v63 = vmul.f32 %v765_v61, %v2222_v25 }
 0x692   :  { %v1842_v11 = vpop.eup %1841  ;;  %v769_v12 = vadd.f32 1e-06, %v767_v63 }
 0x693   :  { %v771_v13 = vmul.f32 %v1842_v11, %v768_v10  ;;  %vm777_vm13 = vweird.f32 %v1842_v11 }
 0x694   :  { %1843 = vrsqrt.f32 %v769_v12  ;;  %vm778_vm2 = vmor %vm776_vm14, %vm777_vm13  ;;  %vm786_vm4 = vweird.f32 %v769_v12 }
 0x695   :  { %v772_v14 = vmul.f32 %v1842_v11, %v771_v13 }
 0x697   :  { %v773_v15 = vmul.f32 0.5, %v772_v14 }
 0x699   :  { %v774_v16 = vsub.f32 1.5, %v773_v15 }
 0x69a   :  { %v1844_v17 = vpop.eup %1843 }
 0x69b   :  { %v775_v57 = vmul.f32 %v1842_v11, %v774_v16  ;;  %v781_v18 = vmul.f32 %v1844_v17, %v769_v12  ;;  %vm787_vm3 = vweird.f32 %v1844_v17 }
 0x69c   :  { %vm788_vm5 = vmor %vm786_vm4, %vm787_vm3 }
 0x69d   :  { %v779_v19 = vsel %vm778_vm2, %v1842_v11, %v775_v57  ;;  %v782_v20 = vmul.f32 %v1844_v17, %v781_v18 }
 0x69e   :  { %v790_v21 = vmul.f32 %v779_v19, %v2348_v47 }
 0x69f   :  { %v783_v22 = vmul.f32 0.5, %v782_v20 }
 0x6a0   :  { %1733 = vmatmul.msk.f32.vlgmr.msrb.gmra.mxu1 %vm209_vm7, %v790_v21 }
 0x6a1   :  { %v784_v23 = vsub.f32 1.5, %v783_v22 }
 0x6a3   :  { %v785_v24 = vmul.f32 %v1844_v17, %v784_v23 }
 0x6a5   :  { %v789_v26 = vsel %vm788_vm5, %v1844_v17, %v785_v24 }
 0x6a6   :  { %v791_v27 = vmul.f32 %v789_v26, %v2354_v60 }
 0x6a8   :  { %1734 = vmatmul.msk.f32.gmra.mxu1 %vm209_vm7, %v791_v27 }
 0x71d   :  { %v819_v30 = vpop.f32.mrf.mxu1 }
 0x71e   :  { %845 = vrot.lane.b32.xlu0 %v819_v30, %s1974_s11  ;;  %v825_v39 = vmul.f32 %v819_v30, %v819_v30 }
 0x720   :  { %v827_v3 = vmul.f32 %v825_v39, %v819_v30 }
 0x722   :  { %v829_v43 = vmul.f32 0.044715, %v827_v3 }
 0x724   :  { %v831_v46 = vadd.f32 %v829_v43, %v819_v30 }
 0x725   :  { %v822_v31 = vpop.f32.mrf.mxu1 }
 0x726   :  { %847 = vrot.lane.b32.xlu2 %v822_v31, %s1974_s11  ;;  %v826_v44 = vmul.f32 %v822_v31, %v822_v31  ;;  %v833_v48 = vmul.f32 0.7978846, %v831_v46 }
 0x728   :  { %v828_v45 = vmul.f32 %v826_v44, %v822_v31  ;;  %1845 = vtanh.f32 %v833_v48  ;;  %v1744_v48 = vld [vmem:[%s2613_s4 + $0x78] sm:$0xff] }
 0x729   :  { %1014 = vmatpush.msrb.mxu3 %v1744_v48 }
 0x72a   :  { %v830_v41 = vmul.f32 0.044715, %v828_v45 }
 0x72c   :  { %v832_v49 = vadd.f32 %v830_v41, %v822_v31  ;;  %v1743_v41 = vld [vmem:[%s2613_s4 + $0x70] sm:$0xff] }
 0x72d   :  { %991 = vmatpush.msrb.mxu2 %v1743_v41 }
 0x72e   :  { %v834_v54 = vmul.f32 0.7978846, %v832_v49  ;;  %v1846_v55 = vpop.eup %1845  ;;  %v1742_v49 = vld [vmem:[%s2613_s4 + $0x68] sm:$0xff] }
 0x72f   :  { %v837_v56 = vadd.f32 1.0, %v1846_v55  ;;  %1015 = vmatpush.msrb.mxu3 %v1742_v49  ;;  %v1740_v55 = vld [vmem:[%s2613_s4 + $0x58] sm:$0xff] }
 0x730   :  { %1847 = vtanh.f32 %v834_v54  ;;  %v1739_v54 = vld [vmem:[%s2613_s4 + $0x50] sm:$0xff] }
 0x731   :  { %v839_v59 = vmul.f32 0.5, %v837_v56  ;;  %1016 = vmatpush.msrb.mxu3 %v1740_v55  ;;  %v1737_v56 = vld [vmem:[%s2613_s4 + $0x40] sm:$0xff] }
 0x733   :  { %v841_v4 = vmul.f32 %v839_v59, %v819_v30  ;;  %v1738_v59 = vld [vmem:[%s2613_s4 + $0x48] sm:$0xff] }
 0x734   :  { %1017 = vmatpush.msrb.mxu3 %v1738_v59 }
 0x736   :  { %v1848_v1 = vpop.eup %1847 }
 0x737   :  { %v838_v2 = vadd.f32 1.0, %v1848_v1 }
 0x739   :  { %v840_v7 = vmul.f32 0.5, %v838_v2 }
 0x73b   :  { %v842_v9 = vmul.f32 %v840_v7, %v822_v31  ;;  %v925_v31 = vperm.slane %v2344_v38, 1 }
 0x780   :  { %v848_v8 = vpop.permute.xlu2 %847 }
 0x781   :  { %v852_v10 = vmul.f32 %v848_v8, %v842_v9 }
 0x790   :  { %v846_v5 = vpop.permute.xlu0 %845 }
 0x791   :  { %v851_v6 = vmul.f32 %v846_v5, %v841_v4 }
 0x793   :  { %1735 = vmatmul.msk.f32.vlgmr.msra.gmra.mxu1 %vm861_vm6, %v851_v6 }
 0x79b   :  { %1736 = vmatmul.msk.f32.gmra.mxu1 %vm861_vm6, %v852_v10 }
 0x810   :  { %v885_v61 = vpop.f32.mrf.mxu1 }
 0x811   :  { %v891_v63 = vmul.f32 %v885_v61, %v885_v61 }
 0x813   :  { %v893_v11 = vsel %vm209_vm7, %v891_v63, 0.0 }
 0x814   :  { %894 = vadd.xlane.f32.xlu1 %v893_v11 }
 0x818   :  { %v888_v12 = vpop.f32.mrf.mxu1 }
 0x819   :  { %v892_v13 = vmul.f32 %v888_v12, %v888_v12 }
 0x81b   :  { %v896_v14 = vsel %vm209_vm7, %v892_v13, 0.0 }
 0x81c   :  { %897 = vadd.xlane.f32.xlu1 %v896_v14 }
 0x887   :  { %v895_v15 = vpop.xlane.xlu1 %894 }
 0x888   :  { %v899_v16 = vmul.f32 %v895_v15, %v2222_v25 }
 0x88a   :  { %v901_v17 = vadd.f32 1e-06, %v899_v16 }
 0x88c   :  { %1849 = vrsqrt.f32 %v901_v17  ;;  %vm909_vm9 = vweird.f32 %v901_v17 }
 0x88f   :  { %v898_v57 = vpop.xlane.xlu1 %897 }
 0x890   :  { %v900_v18 = vmul.f32 %v898_v57, %v2222_v25 }
 0x892   :  { %v1850_v19 = vpop.eup %1849  ;;  %v902_v20 = vadd.f32 1e-06, %v900_v18 }
 0x893   :  { %v904_v21 = vmul.f32 %v1850_v19, %v901_v17  ;;  %vm910_vm8 = vweird.f32 %v1850_v19 }
 0x894   :  { %1851 = vrsqrt.f32 %v902_v20  ;;  %vm911_vm10 = vmor %vm909_vm9, %vm910_vm8  ;;  %vm919_vm12 = vweird.f32 %v902_v20 }
 0x895   :  { %v905_v22 = vmul.f32 %v1850_v19, %v904_v21 }
 0x897   :  { %v906_v23 = vmul.f32 0.5, %v905_v22 }
 0x899   :  { %v907_v24 = vsub.f32 1.5, %v906_v23 }
 0x89a   :  { %v1852_v26 = vpop.eup %1851 }
 0x89b   :  { %v908_v27 = vmul.f32 %v1850_v19, %v907_v24  ;;  %v914_v30 = vmul.f32 %v1852_v26, %v902_v20  ;;  %vm920_vm11 = vweird.f32 %v1852_v26 }
 0x89c   :  { %vm921_vm13 = vmor %vm919_vm12, %vm920_vm11 }
 0x89d   :  { %v912_v33 = vsel %vm911_vm10, %v1850_v19, %v908_v27  ;;  %v915_v34 = vmul.f32 %v1852_v26, %v914_v30 }
 0x89e   :  { %v923_v35 = vmul.f32 %v912_v33, %v885_v61 }
 0x89f   :  { %v916_v36 = vmul.f32 0.5, %v915_v34 }
 0x8a0   :  { %v926_v37 = vmul.f32 %v925_v31, %v923_v35 }
 0x8a1   :  { %v917_v0 = vsub.f32 1.5, %v916_v36 }
 0x8a2   :  { %v2411_v39 = vadd.f32 %v926_v37, %v2348_v47 }
 0x8a3   :  { %v918_v40 = vmul.f32 %v1852_v26, %v917_v0 }
 0x8a4   :  { %v930_v3 = vmul.f32 %v2411_v39, %v2411_v39 }
 0x8a5   :  { %v922_v42 = vsel %vm921_vm13, %v1852_v26, %v918_v40 }
 0x8a6   :  { %v924_v43 = vmul.f32 %v922_v42, %v888_v12  ;;  %v932_v38 = vsel %vm209_vm7, %v930_v3, 0.0 }
 0x8a7   :  { %933 = vadd.xlane.f32.xlu0 %v932_v38 }
 0x8a8   :  { %v927_v44 = vmul.f32 %v925_v31, %v924_v43 }
 0x8aa   :  { %v2417_v45 = vadd.f32 %v927_v44, %v2354_v60  ;;  %v1741_v60 = vld [vmem:[%s2613_s4 + $0x60] sm:$0xff] }
 0x8ab   :  { %992 = vmatpush.msrb.mxu2 %v1741_v60 }
 0x8ac   :  { %v931_v46 = vmul.f32 %v2417_v45, %v2417_v45 }
 0x8ad   :  { %993 = vmatpush.msrb.mxu2 %v1739_v54 }
 0x8ae   :  { %v935_v47 = vsel %vm209_vm7, %v931_v46, 0.0 }
 0x8af   :  { %936 = vadd.xlane.f32.xlu1 %v935_v47  ;;  %994 = vmatpush.msrb.mxu2 %v1737_v56 }
 0x91a   :  { %v934_v1 = vpop.xlane.xlu0 %933 }
 0x91b   :  { %v938_v2 = vmul.f32 %v934_v1, %v2222_v25 }
 0x91d   :  { %v940_v4 = vadd.f32 1e-06, %v938_v2 }
 0x91f   :  { %1853 = vrsqrt.f32 %v940_v4  ;;  %vm948_vm2 = vweird.f32 %v940_v4 }
 0x922   :  { %v937_v5 = vpop.xlane.xlu1 %936 }
 0x923   :  { %v939_v6 = vmul.f32 %v937_v5, %v2222_v25 }
 0x925   :  { %v1854_v7 = vpop.eup %1853  ;;  %v941_v8 = vadd.f32 1e-06, %v939_v6 }
 0x926   :  { %v943_v9 = vmul.f32 %v1854_v7, %v940_v4  ;;  %vm949_vm14 = vweird.f32 %v1854_v7 }
 0x927   :  { %1855 = vrsqrt.f32 %v941_v8  ;;  %vm950_vm3 = vmor %vm948_vm2, %vm949_vm14  ;;  %vm958_vm5 = vweird.f32 %v941_v8 }
 0x928   :  { %v944_v10 = vmul.f32 %v1854_v7, %v943_v9 }
 0x92a   :  { %v945_v61 = vmul.f32 0.5, %v944_v10 }
 0x92c   :  { %v946_v63 = vsub.f32 1.5, %v945_v61 }
 0x92d   :  { %v1856_v11 = vpop.eup %1855 }
 0x92e   :  { %v947_v12 = vmul.f32 %v1854_v7, %v946_v63  ;;  %v953_v13 = vmul.f32 %v1856_v11, %v941_v8  ;;  %vm959_vm4 = vweird.f32 %v1856_v11 }
 0x92f   :  { %vm960_vm8 = vmor %vm958_vm5, %vm959_vm4 }
 0x930   :  { %v951_v14 = vsel %vm950_vm3, %v1854_v7, %v947_v12  ;;  %v954_v15 = vmul.f32 %v1856_v11, %v953_v13 }
 0x931   :  { %v962_v16 = vmul.f32 %v951_v14, %v2411_v39 }
 0x932   :  { %v955_v17 = vmul.f32 0.5, %v954_v15 }
 0x933   :  { %1745 = vmatmul.msk.f32.vlgmr.msrb.gmra.mxu2 %vm209_vm7, %v962_v16  ;;  %1747 = vmatmul.msk.f32.vlgmr.msrb.gmra.mxu3 %vm209_vm7, %v962_v16 }
 0x934   :  { %v956_v57 = vsub.f32 1.5, %v955_v17 }
 0x936   :  { %v957_v18 = vmul.f32 %v1856_v11, %v956_v57 }
 0x938   :  { %v961_v19 = vsel %vm960_vm8, %v1856_v11, %v957_v18 }
 0x939   :  { %v963_v20 = vmul.f32 %v961_v19, %v2417_v45 }
 0x93b   :  { %1746 = vmatmul.msk.f32.gmra.mxu2 %vm209_vm7, %v963_v20  ;;  %1748 = vmatmul.msk.f32.gmra.mxu3 %vm209_vm7, %v963_v20 }
 0x9b6   :  { %v996_v21 = vpop.f32.mrf.mxu2  ;;  %v1019_v22 = vpop.f32.mrf.mxu3 }
 0x9b7   :  { %v1041_v23 = vmul.f32 %v996_v21, %v2247_v50  ;;  %v1027_v27 = vmul.f32 %v996_v21, %v2253_v53  ;;  %v1039_v33 = vmul.f32 %v996_v21, %v2268_v62  ;;  %v1025_v53 = vmul.f32 %v996_v21, %v2228_v28 }
 0x9b9   :  { %1045 = vrot.lane.b32.xlu2 %v1041_v23, %s1973_s17 }
 0x9be   :  { %v999_v24 = vpop.f32.mrf.mxu2  ;;  %v1022_v26 = vpop.f32.mrf.mxu3 }
 0x9bf   :  { %1314 = vmatpush.msra.mxu3 %v1022_v26  ;;  %v1042_v30 = vmul.f32 %v999_v24, %v2249_v51  ;;  %v1028_v31 = vmul.f32 %v999_v24, %v2261_v58  ;;  %v1040_v36 = vmul.f32 %v999_v24, %v2251_v52  ;;  %v1026_v62 = vmul.f32 %v999_v24, %v2233_v29 }
 0x9c0   :  { %v1801_v52 = vpack.i.bf16 %v1022_v26, %v1019_v22 }
 0x9c1   :  { %1031 = vrot.lane.b32.xlu2 %v1027_v27, %s1973_s17  ;;  %1047 = vrot.lane.b32.xlu1 %v1042_v30, %s1973_s17 }
 0x9c9   :  { %1033 = vrot.lane.b32.xlu1 %v1028_v31, %s1973_s17 }
 0xa13   :  { %v1046_v50 = vpop.permute.xlu2 %1045 }
 0xa14   :  { %v1051_v34 = vadd.f32 %v1046_v50, %v1039_v33 }
 0xa16   :  { %1073 = vrot.lane.b32.xlu0 %v1051_v34, %s1974_s11  ;;  %1061 = vrot.lane.b32.xlu2 %v1051_v34, %s1975_s2 }
 0xa1b   :  { %v1032_v35 = vpop.permute.xlu2 %1031 }
 0xa1c   :  { %v1037_v51 = vadd.f32 %v1032_v35, %v1025_v53 }
 0xa1e   :  { %1055 = vrot.lane.b32.xlu1 %v1037_v51, %s1975_s2 }
 0xa33   :  { %v1048_v37 = vpop.permute.xlu1 %1047 }
 0xa34   :  { %v1052_v58 = vadd.f32 %v1048_v37, %v1040_v36 }
 0xa36   :  { %1063 = vrot.lane.b32.xlu2 %v1052_v58, %s1975_s2 }
 0xa3b   :  { %v1034_v0 = vpop.permute.xlu1 %1033 }
 0xa3c   :  { %v1038_v40 = vadd.f32 %v1034_v0, %v1026_v62 }
 0xa3e   :  { %1057 = vrot.lane.b32.xlu1 %v1038_v40, %s1975_s2 }
 0xa70   :  { %v1062_v3 = vpop.permute.xlu2 %1061 }
 0xa71   :  { %1125 = vrot.lane.b32.xlu2 %v1062_v3, %s1974_s11 }
 0xa88   :  { %v1074_v28 = vpop.permute.xlu0 %1073 }
 0xa89   :  { %1749 = vmatpush.xpose.msk.msrb.mxu1 %vm381_vm15, %v1074_v28 }
 0xa8c   :  { %1750 = vmatmul.msk.f32.vlgmr.msrb.gmra.mxu1 %vm381_vm15, %v1037_v51 }
 0xa90   :  { %v1064_v42 = vpop.permute.xlu2 %1063  ;;  %v1056_v43 = vpop.permute.xlu1 %1055 }
 0xa91   :  { %1151 = vrot.lane.b32.xlu2 %v1064_v42, %s1974_s11 }
 0xa99   :  { %1099 = vrot.lane.b32.xlu2 %v1052_v58, %s1974_s11 }
 0xaa1   :  { %1802 = vrot.lane.b32.xlu2 %v1801_v52, %s1975_s2 }
 0xab0   :  { %v1058_v44 = vpop.permute.xlu1 %1057 }
 0xacb   :  { %v1126_v29 = vpop.permute.xlu2 %1125 }
 0xacc   :  { %1753 = vmatpush.xpose.msk.msrb.mxu0 %vm381_vm15, %v1126_v29 }
 0xacf   :  { %1754 = vmatmul.msk.f32.vlgmr.msrb.gmra.mxu0 %vm381_vm15, %v1056_v43 }
 0xaeb   :  { %v1152_v38 = vpop.permute.xlu2 %1151 }
 0xaec   :  { %1755 = vmatpush.xpose.msk.msra.mxu1 %vm381_vm15, %v1152_v38 }
 0xaef   :  { %1756 = vmatmul.msk.f32.vlgmr.msra.gmra.mxu1 %vm381_vm15, %v1058_v44 }
 0xaf3   :  { %v1100_v46 = vpop.permute.xlu2 %1099 }
 0xaf4   :  { %1751 = vmatpush.xpose.msk.msra.mxu2 %vm381_vm15, %v1100_v46 }
 0xaf7   :  { %1752 = vmatmul.msk.f32.vlgmr.msra.gmra.mxu2 %vm381_vm15, %v1038_v40 }
 0xaf8   :  { %1291 = vmatpush.msrb.mxu2 %v1019_v22 }
 0xafb   :  { %v1803_v47 = vpop.permute.xlu2 %1802 }
 0xafc   :  { %v1805_v41 = vunpack.i.h.bf16 %v1803_v47  ;;  %v1804_v48 = vunpack.i.l.bf16 %v1803_v47 }
 0xafe   :  { %1337 = vmatpush.msra.mxu0 %v1804_v48  ;;  %1360 = vmatpush.msrb.mxu1 %v1805_v41 }
 0xb09   :  { %v1096_v60 = vpop.f32.mrf.mxu1 }
 0xb0a   :  { %v1177_v49 = vmul.f32 0.005, %v1096_v60 }
 0xb0c   :  { %1857 = vtanh.f32 %v1177_v49 }
 0xb12   :  { %v1858_v54 = vpop.eup %1857 }
 0xb13   :  { %v1185_v55 = vmul.f32 50.0, %v1858_v54 }
 0xb15   :  { %v1189_v56 = vsel %vm2292_vm0, %v1185_v55, -1e+30 }
 0xb16   :  { %v1193_v59 = vmul.f32 1.442695, %v1189_v56 }
 0xb18   :  { %1859 = vpow2.f32 %v1193_v59 }
 0xb1e   :  { %v1860_v1 = vpop.eup %1859 }
 0xb1f   :  { %v1201_v2 = vsel %vm510_vm1, %v1860_v1, 0.0 }
 0xb20   :  { %1202 = vadd.xlane.f32.xlu2 %v1201_v2 }
 0xb4c   :  { %v1148_v4 = vpop.f32.mrf.mxu0 }
 0xb4d   :  { %v1179_v5 = vmul.f32 0.005, %v1148_v4 }
 0xb4f   :  { %1861 = vtanh.f32 %v1179_v5 }
 0xb55   :  { %v1862_v6 = vpop.eup %1861 }
 0xb56   :  { %v1187_v7 = vmul.f32 50.0, %v1862_v6 }
 0xb58   :  { %v1191_v8 = vsel %vm2292_vm0, %v1187_v7, -1e+30 }
 0xb59   :  { %v1197_v9 = vmul.f32 1.442695, %v1191_v8 }
 0xb5b   :  { %1863 = vpow2.f32 %v1197_v9 }
 0xb61   :  { %v1864_v10 = vpop.eup %1863 }
 0xb62   :  { %v1207_v61 = vsel %vm510_vm1, %v1864_v10, 0.0 }
 0xb63   :  { %1208 = vadd.xlane.f32.xlu0 %v1207_v61 }
 0xb6c   :  { %v1174_v63 = vpop.f32.mrf.mxu1 }
 0xb6d   :  { %v1180_v11 = vmul.f32 0.005, %v1174_v63 }
 0xb6f   :  { %1865 = vtanh.f32 %v1180_v11 }
 0xb75   :  { %v1866_v12 = vpop.eup %1865 }
 0xb76   :  { %v1188_v13 = vmul.f32 50.0, %v1866_v12 }
 0xb78   :  { %v1192_v14 = vsel %vm2292_vm0, %v1188_v13, -1e+30 }
 0xb79   :  { %v1199_v15 = vmul.f32 1.442695, %v1192_v14  ;;  %v1764_v14 = vld [vmem:[%s2614_s5 + $0x38] sm:$0xff] }
 0xb7a   :  { %v1122_v16 = vpop.f32.mrf.mxu2  ;;  %1398 = vmatpush.msra.mxu2 %v1764_v14 }
 0xb7b   :  { %1867 = vpow2.f32 %v1199_v15  ;;  %v1178_v17 = vmul.f32 0.005, %v1122_v16  ;;  %v1763_v15 = vld [vmem:[%s2614_s5 + $0x30] sm:$0xff]  ;;  %v1762_v16 = vld [vmem:[%s2614_s5 + $0x28] sm:$0xff] }
 0xb7c   :  { %1399 = vmatpush.msra.mxu2 %v1763_v15 }
 0xb7d   :  { %1869 = vtanh.f32 %v1178_v17 }
 0xb7e   :  { %1400 = vmatpush.msra.mxu2 %v1762_v16 }
 0xb81   :  { %v2491_v57 = vpop.eup %1867 }
 0xb82   :  { %v1210_v18 = vsel %vm510_vm1, %v2491_v57, 0.0 }
 0xb83   :  { %v1870_v19 = vpop.eup %1869  ;;  %1211 = vadd.xlane.f32.xlu1 %v1210_v18 }
 0xb84   :  { %v1186_v20 = vmul.f32 50.0, %v1870_v19 }
 0xb86   :  { %v1190_v21 = vsel %vm2292_vm0, %v1186_v20, -1e+30 }
 0xb87   :  { %v1195_v22 = vmul.f32 1.442695, %v1190_v21 }
 0xb89   :  { %1871 = vpow2.f32 %v1195_v22 }
 0xb8f   :  { %v2497_v23 = vpop.eup %1871 }
 0xb90   :  { %v1204_v24 = vsel %vm510_vm1, %v2497_v23, 0.0 }
 0xb91   :  { %1205 = vadd.xlane.f32.xlu0 %v1204_v24 }
 0xb93   :  { %v1203_v26 = vpop.xlane.xlu2 %1202 }
 0xb94   :  { %1873 = vrcp.f32 %v1203_v26  ;;  %v1224_v33 = vand.u32 2147483648, %v1203_v26  ;;  %v1222_v34 = vand.u32 2147483647, %v1203_v26  ;;  %vm1218_vm10 = vweird.f32 %v1203_v26 }
 0xb96   :  { %v1225_v32 = vor.u32 1.1754944e-38, %v1224_v33  ;;  %vm1223_vm11 = vcmp.eq.f32.partialorder %v1222_v34, 8.507059e+37 }
 0xb9a   :  { %v1874_v27 = vpop.eup %1873 }
 0xb9b   :  { %v1214_v30 = vmul.f32 %v1874_v27, %v1203_v26  ;;  %vm1219_vm9 = vweird.f32 %v1874_v27 }
 0xb9c   :  { %vm1220_vm0 = vmor %vm1218_vm10, %vm1219_vm9 }
 0xb9d   :  { %v1215_v31 = vsub.f32 1.0, %v1214_v30 }
 0xb9f   :  { %v1216_v50 = vmul.f32 %v1874_v27, %v1215_v31 }
 0xba1   :  { %v1217_v53 = vadd.f32 %v1874_v27, %v1216_v50 }
 0xba3   :  { %v1221_v35 = vsel %vm1220_vm0, %v1874_v27, %v1217_v53 }
 0xba4   :  { %v1226_v51 = vsel %vm1223_vm11, %v1225_v32, %v1221_v35 }
 0xba5   :  { %v1227_v36 = vmul.f32 %v1860_v1, %v1226_v51 }
 0xba7   :  { %1757 = vmatmul.msk.f32.vlgmr.msrb.gmra.mxu2 %vm510_vm1, %v1227_v36 }
 0xbd6   :  { %v1209_v37 = vpop.xlane.xlu0 %1208 }
 0xbd7   :  { %1875 = vrcp.f32 %v1209_v37  ;;  %v1254_v40 = vand.u32 2147483648, %v1209_v37  ;;  %v1252_v28 = vand.u32 2147483647, %v1209_v37  ;;  %vm1248_vm13 = vweird.f32 %v1209_v37 }
 0xbd9   :  { %v1255_v52 = vor.u32 1.1754944e-38, %v1254_v40  ;;  %vm1253_vm2 = vcmp.eq.f32.partialorder %v1252_v28, 8.507059e+37 }
 0xbdd   :  { %v1876_v58 = vpop.eup %1875 }
 0xbde   :  { %v1244_v62 = vmul.f32 %v1876_v58, %v1209_v37  ;;  %vm1249_vm12 = vweird.f32 %v1876_v58 }
 0xbdf   :  { %vm1250_vm14 = vmor %vm1248_vm13, %vm1249_vm12 }
 0xbe0   :  { %v1245_v0 = vsub.f32 1.0, %v1244_v62 }
 0xbe2   :  { %v1246_v3 = vmul.f32 %v1876_v58, %v1245_v0 }
 0xbe4   :  { %v1247_v42 = vadd.f32 %v1876_v58, %v1246_v3 }
 0xbe6   :  { %v1251_v29 = vsel %vm1250_vm14, %v1876_v58, %v1247_v42  ;;  %v2528_v58 = vld [vmem:[#allocation4 + $0x2] sm:$0x3] }
 0xbe7   :  { %v1256_v43 = vsel %vm1253_vm2, %v1255_v52, %v1251_v29  ;;  %v1445_v0 = vperm.slane %v2528_v58, 0 }
 0xbe8   :  { %v1257_v38 = vmul.f32 %v1864_v10, %v1256_v43 }
 0xbea   :  { %1759 = vmatmul.msk.f32.vlgmr.msra.gmra.mxu0 %vm510_vm1, %v1257_v38 }
 0xbf6   :  { %v1212_v44 = vpop.xlane.xlu1 %1211 }
 0xbf7   :  { %1877 = vrcp.f32 %v1212_v44  ;;  %v1269_v48 = vand.u32 2147483648, %v1212_v44  ;;  %v1267_v49 = vand.u32 2147483647, %v1212_v44  ;;  %vm1263_vm4 = vweird.f32 %v1212_v44 }
 0xbf9   :  { %v1270_v56 = vor.u32 1.1754944e-38, %v1269_v48  ;;  %vm1268_vm8 = vcmp.eq.f32.partialorder %v1267_v49, 8.507059e+37 }
 0xbfd   :  { %v1878_v46 = vpop.eup %1877 }
 0xbfe   :  { %v1259_v47 = vmul.f32 %v1878_v46, %v1212_v44  ;;  %vm1264_vm3 = vweird.f32 %v1878_v46 }
 0xbff   :  { %vm1265_vm5 = vmor %vm1263_vm4, %vm1264_vm3 }
 0xc00   :  { %v1260_v41 = vsub.f32 1.0, %v1259_v47 }
 0xc02   :  { %v1261_v60 = vmul.f32 %v1878_v46, %v1260_v41 }
 0xc04   :  { %v1262_v54 = vadd.f32 %v1878_v46, %v1261_v60  ;;  %v1206_v55 = vpop.xlane.xlu0 %1205 }
 0xc05   :  { %1879 = vrcp.f32 %v1206_v55  ;;  %v1239_v7 = vand.u32 2147483648, %v1206_v55  ;;  %v1237_v9 = vand.u32 2147483647, %v1206_v55  ;;  %vm1233_vm10 = vweird.f32 %v1206_v55 }
 0xc06   :  { %v1266_v59 = vsel %vm1265_vm5, %v1878_v46, %v1262_v54 }
 0xc07   :  { %v1271_v1 = vsel %vm1268_vm8, %v1270_v56, %v1266_v59  ;;  %v1240_v61 = vor.u32 1.1754944e-38, %v1239_v7  ;;  %vm1238_vm11 = vcmp.eq.f32.partialorder %v1237_v9, 8.507059e+37 }
 0xc08   :  { %v1272_v2 = vmul.f32 %v2491_v57, %v1271_v1  ;;  %v1761_v57 = vld [vmem:[%s2614_s5 + $0x20] sm:$0xff] }
 0xc09   :  { %1401 = vmatpush.msra.mxu2 %v1761_v57 }
 0xc0a   :  { %1760 = vmatmul.msk.f32.vlgmr.msrb.gmra.mxu1 %vm510_vm1, %v1272_v2  ;;  %v1770_v2 = vld [vmem:[%s2615_s6 + $0x38] sm:$0xff] }
 0xc0b   :  { %v1880_v4 = vpop.eup %1879  ;;  %1507 = vmatpush.msrb.mxu3 %v1770_v2 }
 0xc0c   :  { %v1229_v5 = vmul.f32 %v1880_v4, %v1206_v55  ;;  %vm1234_vm9 = vweird.f32 %v1880_v4 }
 0xc0d   :  { %vm1235_vm0 = vmor %vm1233_vm10, %vm1234_vm9 }
 0xc0e   :  { %v1230_v6 = vsub.f32 1.0, %v1229_v5  ;;  %v1767_v5 = vld [vmem:[%s2615_s6 + $0x20] sm:$0xff] }
 0xc10   :  { %v1231_v8 = vmul.f32 %v1880_v4, %v1230_v6 }
 0xc12   :  { %v1232_v10 = vadd.f32 %v1880_v4, %v1231_v8 }
 0xc14   :  { %v1236_v63 = vsel %vm1235_vm0, %v1880_v4, %v1232_v10  ;;  %v1769_v4 = vld [vmem:[%s2615_s6 + $0x30] sm:$0xff] }
 0xc15   :  { %v1241_v11 = vsel %vm1238_vm11, %v1240_v61, %v1236_v63  ;;  %1508 = vmatpush.msrb.mxu3 %v1769_v4 }
 0xc16   :  { %v1242_v12 = vmul.f32 %v2497_v23, %v1241_v11 }
 0xc18   :  { %1758 = vmatmul.msk.f32.vlgmr.msra.gmra.mxu3 %vm510_vm1, %v1242_v12 }
 0xc2a   :  { %v1293_v18 = vpop.f32.mrf.mxu2 }
 0xc67   :  { %v1339_v13 = vpop.f32.mrf.mxu0 }
 0xc68   :  { %1367 = vrot.lane.b32.xlu1 %v1339_v13, %s1976_s15 }
 0xc87   :  { %v1362_v17 = vpop.f32.mrf.mxu1 }
 0xc88   :  { %1369 = vrot.lane.b32.xlu0 %v1362_v17, %s1976_s15  ;;  %s1671_s15 = sshll.u32 %s2619_s10, 4  ;;  %s1672_s15 = int_to_ptr.hbm [resolvable:$true] %s1671_s15 }
 0xc9b   :  { %v1316_v21 = vpop.f32.mrf.mxu3 }
 0xcda   :  { %v1368_v19 = vpop.permute.xlu1 %1367 }
 0xcdb   :  { %v1373_v20 = vsel %vm381_vm15, %v1293_v18, %v1368_v19 }
 0xcdc   :  { %1765 = vmatmul.msk.f32.vlgmr.msra.gmra.mxu2 %vm209_vm7, %v1373_v20 }
 0xcfa   :  { %v1370_v22 = vpop.permute.xlu0 %1369 }
 0xcfb   :  { %v1374_v23 = vsel %vm381_vm15, %v1316_v21, %v1370_v22 }
 0xcfc   :  { %1766 = vmatmul.msk.f32.gmra.mxu2 %vm209_vm7, %v1374_v23 }
 0xd5f   :  { %v1403_v24 = vpop.f32.mrf.mxu2 }
 0xd60   :  { %v1411_v26 = vmul.f32 %v1403_v24, %v1403_v24 }
 0xd62   :  { %v1413_v27 = vsel %vm209_vm7, %v1411_v26, 0.0 }
 0xd63   :  { %1414 = vadd.xlane.f32.xlu2 %v1413_v27  ;;  %v1780_v27 = vld [vmem:[%s2616_s7 + $0x78] sm:$0xff] }
 0xd64   :  { %1569 = vmatpush.msrb.mxu0 %v1780_v27 }
 0xd7f   :  { %v1406_v30 = vpop.f32.mrf.mxu2 }
 0xd80   :  { %v1412_v31 = vmul.f32 %v1406_v30, %v1406_v30 }
 0xd82   :  { %v1416_v33 = vsel %vm209_vm7, %v1412_v31, 0.0  ;;  %v1778_v31 = vld [vmem:[%s2616_s7 + $0x68] sm:$0xff] }
 0xd83   :  { %1417 = vadd.xlane.f32.xlu2 %v1416_v33  ;;  %v1777_v33 = vld [vmem:[%s2616_s7 + $0x60] sm:$0xff] }
 0xdd6   :  { %v1415_v50 = vpop.xlane.xlu2 %1414 }
 0xdd7   :  { %v1419_v34 = vmul.f32 %v1415_v50, %v2222_v25  ;;  %v1776_v50 = vld [vmem:[%s2616_s7 + $0x58] sm:$0xff] }
 0xdd9   :  { %v1421_v53 = vadd.f32 1e-06, %v1419_v34  ;;  %v1775_v34 = vld [vmem:[%s2616_s7 + $0x50] sm:$0xff] }
 0xddb   :  { %1881 = vrsqrt.f32 %v1421_v53  ;;  %vm1429_vm1 = vweird.f32 %v1421_v53 }
 0xde1   :  { %v1882_v32 = vpop.eup %1881 }
 0xde2   :  { %v1424_v35 = vmul.f32 %v1882_v32, %v1421_v53  ;;  %vm1430_vm15 = vweird.f32 %v1882_v32  ;;  %v1774_v53 = vld [vmem:[%s2616_s7 + $0x48] sm:$0xff] }
 0xde3   :  { %vm1431_vm12 = vmor %vm1429_vm1, %vm1430_vm15 }
 0xde4   :  { %v1425_v51 = vmul.f32 %v1882_v32, %v1424_v35 }
 0xde6   :  { %v1426_v36 = vmul.f32 0.5, %v1425_v51 }
 0xde8   :  { %v1427_v37 = vsub.f32 1.5, %v1426_v36  ;;  %v1773_v36 = vld [vmem:[%s2616_s7 + $0x40] sm:$0xff] }
 0xdea   :  { %v1428_v62 = vmul.f32 %v1882_v32, %v1427_v37 }
 0xdec   :  { %v1432_v40 = vsel %vm1431_vm12, %v1882_v32, %v1428_v62 }
 0xded   :  { %v1443_v3 = vmul.f32 %v1432_v40, %v1403_v24 }
 0xdef   :  { %v1446_v28 = vmul.f32 %v1445_v0, %v1443_v3 }
 0xdf1   :  { %v2532_v42 = vadd.f32 %v1446_v28, %v2411_v39 }
 0xdf3   :  { %v1450_v52 = vmul.f32 %v2532_v42, %v2532_v42 }
 0xdf5   :  { %v1452_v29 = vsel %vm209_vm7, %v1450_v52, 0.0 }
 0xdf6   :  { %1453 = vadd.xlane.f32.xlu1 %v1452_v29  ;;  %v1418_v43 = vpop.xlane.xlu2 %1417 }
 0xdf7   :  { %v1420_v38 = vmul.f32 %v1418_v43, %v2222_v25 }
 0xdf9   :  { %v1422_v44 = vadd.f32 1e-06, %v1420_v38 }
 0xdfb   :  { %1883 = vrsqrt.f32 %v1422_v44  ;;  %vm1439_vm14 = vweird.f32 %v1422_v44 }
 0xe01   :  { %v1884_v46 = vpop.eup %1883 }
 0xe02   :  { %v1434_v47 = vmul.f32 %v1884_v46, %v1422_v44  ;;  %vm1440_vm13 = vweird.f32 %v1884_v46 }
 0xe03   :  { %vm1441_vm2 = vmor %vm1439_vm14, %vm1440_vm13 }
 0xe04   :  { %v1435_v41 = vmul.f32 %v1884_v46, %v1434_v47 }
 0xe06   :  { %v1436_v48 = vmul.f32 0.5, %v1435_v41 }
 0xe08   :  { %v1437_v60 = vsub.f32 1.5, %v1436_v48 }
 0xe0a   :  { %v1438_v49 = vmul.f32 %v1884_v46, %v1437_v60 }
 0xe0c   :  { %v1442_v39 = vsel %vm1441_vm2, %v1884_v46, %v1438_v49 }
 0xe0d   :  { %v1444_v54 = vmul.f32 %v1442_v39, %v1406_v30  ;;  %v1779_v30 = vld [vmem:[%s2616_s7 + $0x70] sm:$0xff] }
 0xe0e   :  { %1570 = vmatpush.msrb.mxu0 %v1779_v30 }
 0xe0f   :  { %v1447_v55 = vmul.f32 %v1445_v0, %v1444_v54 }
 0xe10   :  { %1571 = vmatpush.msrb.mxu0 %v1778_v31 }
 0xe11   :  { %v2539_v56 = vadd.f32 %v1447_v55, %v2417_v45  ;;  %v1768_v45 = vld [vmem:[%s2615_s6 + $0x28] sm:$0xff] }
 0xe12   :  { %1509 = vmatpush.msrb.mxu3 %v1768_v45  ;;  %1572 = vmatpush.msrb.mxu0 %v1777_v33 }
 0xe13   :  { %v1451_v59 = vmul.f32 %v2539_v56, %v2539_v56 }
 0xe14   :  { %1510 = vmatpush.msrb.mxu3 %v1767_v5  ;;  %1573 = vmatpush.msrb.mxu0 %v1776_v50 }
 0xe15   :  { %v1455_v1 = vsel %vm209_vm7, %v1451_v59, 0.0 }
 0xe16   :  { %1456 = vadd.xlane.f32.xlu2 %v1455_v1  ;;  %1574 = vmatpush.msrb.mxu0 %v1775_v34 }
 0xe18   :  { %1575 = vmatpush.msrb.mxu0 %v1774_v53 }
 0xe1a   :  { %1576 = vmatpush.msrb.mxu0 %v1773_v36 }
 0xe69   :  { %v1454_v6 = vpop.xlane.xlu1 %1453 }
 0xe6a   :  { %v1458_v7 = vmul.f32 %v1454_v6, %v2222_v25 }
 0xe6c   :  { %v1460_v8 = vadd.f32 1e-06, %v1458_v7 }
 0xe6e   :  { %1885 = vrsqrt.f32 %v1460_v8  ;;  %vm1468_vm4 = vweird.f32 %v1460_v8 }
 0xe74   :  { %v1886_v9 = vpop.eup %1885 }
 0xe75   :  { %v1463_v10 = vmul.f32 %v1886_v9, %v1460_v8  ;;  %vm1469_vm3 = vweird.f32 %v1886_v9 }
 0xe76   :  { %vm1470_vm5 = vmor %vm1468_vm4, %vm1469_vm3 }
 0xe77   :  { %v1464_v61 = vmul.f32 %v1886_v9, %v1463_v10 }
 0xe79   :  { %v1465_v63 = vmul.f32 0.5, %v1464_v61 }
 0xe7b   :  { %v1466_v11 = vsub.f32 1.5, %v1465_v63 }
 0xe7d   :  { %v1467_v12 = vmul.f32 %v1886_v9, %v1466_v11 }
 0xe7f   :  { %v1471_v13 = vsel %vm1470_vm5, %v1886_v9, %v1467_v12 }
 0xe80   :  { %v1482_v14 = vmul.f32 %v1471_v13, %v2532_v42 }
 0xe82   :  { %1771 = vmatmul.msk.f32.vlgmr.msrb.gmra.mxu3 %vm209_vm7, %v1482_v14 }
 0xe89   :  { %v1457_v15 = vpop.xlane.xlu2 %1456 }
 0xe8a   :  { %v1459_v16 = vmul.f32 %v1457_v15, %v2222_v25 }
 0xe8c   :  { %v1461_v17 = vadd.f32 1e-06, %v1459_v16 }
 0xe8e   :  { %1887 = vrsqrt.f32 %v1461_v17  ;;  %vm1478_vm9 = vweird.f32 %v1461_v17 }
 0xe94   :  { %v1888_v57 = vpop.eup %1887 }
 0xe95   :  { %v1473_v18 = vmul.f32 %v1888_v57, %v1461_v17  ;;  %vm1479_vm8 = vweird.f32 %v1888_v57 }
 0xe96   :  { %vm1480_vm10 = vmor %vm1478_vm9, %vm1479_vm8 }
 0xe97   :  { %v1474_v19 = vmul.f32 %v1888_v57, %v1473_v18 }
 0xe99   :  { %v1475_v20 = vmul.f32 0.5, %v1474_v19 }
 0xe9b   :  { %v1476_v21 = vsub.f32 1.5, %v1475_v20 }
 0xe9d   :  { %v1477_v22 = vmul.f32 %v1888_v57, %v1476_v21 }
 0xe9f   :  { %v1481_v23 = vsel %vm1480_vm10, %v1888_v57, %v1477_v22  ;;  %v1618_v57 = vperm.slane %v2528_v58, 1 }
 0xea0   :  { %v1483_v24 = vmul.f32 %v1481_v23, %v2539_v56 }
 0xea2   :  { %1772 = vmatmul.msk.f32.gmra.mxu3 %vm209_vm7, %v1483_v24 }
 0xf05   :  { %v1512_v26 = vpop.f32.mrf.mxu3 }
 0xf06   :  { %1538 = vrot.lane.b32.xlu0 %v1512_v26, %s1974_s11  ;;  %v1518_v35 = vmul.f32 %v1512_v26, %v1512_v26 }
 0xf08   :  { %v1520_v51 = vmul.f32 %v1518_v35, %v1512_v26 }
 0xf0a   :  { %v1522_v37 = vmul.f32 0.044715, %v1520_v51 }
 0xf0c   :  { %v1524_v40 = vadd.f32 %v1522_v37, %v1512_v26 }
 0xf0e   :  { %v1526_v28 = vmul.f32 0.7978846, %v1524_v40 }
 0xf10   :  { %1889 = vtanh.f32 %v1526_v28 }
 0xf16   :  { %v1890_v43 = vpop.eup %1889 }
 0xf17   :  { %v1530_v38 = vadd.f32 1.0, %v1890_v43  ;;  %v1806_v43 = vld [vmem:[%s2618_s9] ss:$0 sm:$0xff]  ;;  %s1978_s9 = smov 128  }
 0xf19   :  { %v1532_v44 = vmul.f32 0.5, %v1530_v38 }
 0xf1b   :  { %v1534_v47 = vmul.f32 %v1532_v44, %v1512_v26 }
 0xf25   :  { %v1515_v32 = vpop.f32.mrf.mxu3 }
 0xf26   :  { %1540 = vrot.lane.b32.xlu2 %v1515_v32, %s1974_s11  ;;  %v1519_v62 = vmul.f32 %v1515_v32, %v1515_v32 }
 0xf28   :  { %v1521_v0 = vmul.f32 %v1519_v62, %v1515_v32 }
 0xf2a   :  { %v1523_v3 = vmul.f32 0.044715, %v1521_v0 }
 0xf2c   :  { %v1525_v52 = vadd.f32 %v1523_v3, %v1515_v32 }
 0xf2e   :  { %v1527_v29 = vmul.f32 0.7978846, %v1525_v52 }
 0xf30   :  { %1891 = vtanh.f32 %v1527_v29 }
 0xf36   :  { %v1892_v46 = vpop.eup %1891 }
 0xf37   :  { %v1531_v41 = vadd.f32 1.0, %v1892_v46 }
 0xf39   :  { %v1533_v49 = vmul.f32 0.5, %v1531_v41 }
 0xf3b   :  { %v1535_v39 = vmul.f32 %v1533_v49, %v1515_v32 }
 0xf78   :  { %v1539_v48 = vpop.permute.xlu0 %1538 }
 0xf79   :  { %v1544_v60 = vmul.f32 %v1539_v48, %v1534_v47 }
 0xf7b   :  { %1781 = vmatmul.msk.f32.vlgmr.msrb.gmra.mxu0 %vm861_vm6, %v1544_v60 }
 0xf80   :  { %v1541_v54 = vpop.permute.xlu2 %1540 }
 0xf81   :  { %v1545_v55 = vmul.f32 %v1541_v54, %v1535_v39 }
 0xf83   :  { %1782 = vmatmul.msk.f32.gmra.mxu0 %vm861_vm6, %v1545_v55 }
 0xff8   :  { %v1578_v59 = vpop.f32.mrf.mxu0 }
 0xff9   :  { %v1584_v1 = vmul.f32 %v1578_v59, %v1578_v59 }
 0xffb   :  { %v1586_v2 = vsel %vm209_vm7, %v1584_v1, 0.0 }
 0xffc   :  { %1587 = vadd.xlane.f32.xlu0 %v1586_v2 }
0x1000   :  { %v1581_v4 = vpop.f32.mrf.mxu0 }
0x1001   :  { %v1585_v45 = vmul.f32 %v1581_v4, %v1581_v4 }
0x1003   :  { %v1589_v5 = vsel %vm209_vm7, %v1585_v45, 0.0 }
0x1004   :  { %1590 = vadd.xlane.f32.xlu2 %v1589_v5 }
0x106f   :  { %v1588_v6 = vpop.xlane.xlu0 %1587 }
0x1070   :  { %v1592_v7 = vmul.f32 %v1588_v6, %v2222_v25 }
0x1072   :  { %v1594_v8 = vadd.f32 1e-06, %v1592_v7 }
0x1074   :  { %1893 = vrsqrt.f32 %v1594_v8  ;;  %vm1602_vm0 = vweird.f32 %v1594_v8 }
0x1077   :  { %v1591_v9 = vpop.xlane.xlu2 %1590 }
0x1078   :  { %v1593_v10 = vmul.f32 %v1591_v9, %v2222_v25 }
0x107a   :  { %v1894_v61 = vpop.eup %1893  ;;  %v1595_v63 = vadd.f32 1e-06, %v1593_v10 }
0x107b   :  { %v1597_v11 = vmul.f32 %v1894_v61, %v1594_v8  ;;  %vm1603_vm6 = vweird.f32 %v1894_v61 }
0x107c   :  { %1895 = vrsqrt.f32 %v1595_v63  ;;  %vm1604_vm11 = vmor %vm1602_vm0, %vm1603_vm6  ;;  %vm1612_vm1 = vweird.f32 %v1595_v63 }
0x107d   :  { %v1598_v12 = vmul.f32 %v1894_v61, %v1597_v11 }
0x107f   :  { %v1599_v13 = vmul.f32 0.5, %v1598_v12 }
0x1081   :  { %v1600_v14 = vsub.f32 1.5, %v1599_v13 }
0x1082   :  { %v1896_v15 = vpop.eup %1895 }
0x1083   :  { %v1601_v16 = vmul.f32 %v1894_v61, %v1600_v14  ;;  %v1607_v17 = vmul.f32 %v1896_v15, %v1595_v63  ;;  %vm1613_vm15 = vweird.f32 %v1896_v15 }
0x1084   :  { %vm1614_vm12 = vmor %vm1612_vm1, %vm1613_vm15 }
0x1085   :  { %v1605_v18 = vsel %vm1604_vm11, %v1894_v61, %v1601_v16  ;;  %v1608_v19 = vmul.f32 %v1896_v15, %v1607_v17 }
0x1086   :  { %v1616_v20 = vmul.f32 %v1605_v18, %v1578_v59 }
0x1087   :  { %v1609_v21 = vmul.f32 0.5, %v1608_v19 }
0x1088   :  { %v1619_v22 = vmul.f32 %v1618_v57, %v1616_v20 }
0x1089   :  { %v1610_v23 = vsub.f32 1.5, %v1609_v21 }
0x108a   :  { %v1621_v24 = vadd.f32 %v1619_v22, %v2532_v42 }
0x108b   :  { %v1611_v26 = vmul.f32 %v1896_v15, %v1610_v23 }
0x108c   :  { %v1623_v27 = vmul.f32 %v1621_v24, %v1621_v24 }
0x108d   :  { %v1615_v30 = vsel %vm1614_vm12, %v1896_v15, %v1611_v26 }
0x108e   :  { %v1625_v31 = vsel %vm209_vm7, %v1623_v27, 0.0  ;;  %v1617_v33 = vmul.f32 %v1615_v30, %v1581_v4 }
0x108f   :  { %1626 = vadd.xlane.f32.xlu1 %v1625_v31 }
0x1090   :  { %v1620_v50 = vmul.f32 %v1618_v57, %v1617_v33 }
0x1092   :  { %v1622_v58 = vadd.f32 %v1620_v50, %v2539_v56 }
0x1094   :  { %v1624_v34 = vmul.f32 %v1622_v58, %v1622_v58 }
0x1096   :  { %v1628_v53 = vsel %vm209_vm7, %v1624_v34, 0.0 }
0x1097   :  { %1629 = vadd.xlane.f32.xlu1 %v1628_v53 }
0x1102   :  { %v1627_v32 = vpop.xlane.xlu1 %1626 }
0x1103   :  { %v1631_v35 = vmul.f32 %v1627_v32, %v2222_v25 }
0x1105   :  { %v1633_v42 = vadd.f32 1e-06, %v1631_v35 }
0x1107   :  { %1897 = vrsqrt.f32 %v1633_v42  ;;  %vm1641_vm14 = vweird.f32 %v1633_v42 }
0x110a   :  { %v1630_v51 = vpop.xlane.xlu1 %1629 }
0x110b   :  { %v1632_v36 = vmul.f32 %v1630_v51, %v2222_v25 }
0x110d   :  { %v1898_v37 = vpop.eup %1897  ;;  %v1634_v62 = vadd.f32 1e-06, %v1632_v36 }
0x110e   :  { %v1636_v0 = vmul.f32 %v1898_v37, %v1633_v42  ;;  %vm1642_vm13 = vweird.f32 %v1898_v37 }
0x110f   :  { %1899 = vrsqrt.f32 %v1634_v62  ;;  %vm1643_vm2 = vmor %vm1641_vm14, %vm1642_vm13  ;;  %vm1651_vm4 = vweird.f32 %v1634_v62 }
0x1110   :  { %v1637_v40 = vmul.f32 %v1898_v37, %v1636_v0 }
0x1112   :  { %v1638_v3 = vmul.f32 0.5, %v1637_v40 }
0x1114   :  { %v1639_v28 = vsub.f32 1.5, %v1638_v3 }
0x1115   :  { %v1900_v56 = vpop.eup %1899 }
0x1116   :  { %v1640_v52 = vmul.f32 %v1898_v37, %v1639_v28  ;;  %v1646_v29 = vmul.f32 %v1900_v56, %v1634_v62  ;;  %vm1652_vm3 = vweird.f32 %v1900_v56 }
0x1117   :  { %vm1653_vm5 = vmor %vm1651_vm4, %vm1652_vm3 }
0x1118   :  { %v1644_v38 = vsel %vm1643_vm2, %v1898_v37, %v1640_v52  ;;  %v1647_v44 = vmul.f32 %v1900_v56, %v1646_v29 }
0x1119   :  { %v1655_v25 = vmul.f32 %v1644_v38, %v1621_v24 }
0x111a   :  { %v1648_v46 = vmul.f32 0.5, %v1647_v44 }
0x111b   :  { %v1661_v47 = vmul.f32 %v1806_v43, %v1655_v25 }
0x111c   :  { %v1649_v41 = vsub.f32 1.5, %v1648_v46 }
0x111d   :  { %1663 = vst.msk [vmem:[#allocation7] sm:$0xff] %vm209_vm7, %v1661_v47 }
0x111e   :  { %v1650_v48 = vmul.f32 %v1900_v56, %v1649_v41 }
0x1120   :  { %v1654_v60 = vsel %vm1653_vm5, %v1900_v56, %v1650_v48 }
0x1121   :  { %v1656_v49 = vmul.f32 %v1654_v60, %v1622_v58 }
0x1123   :  { %v1662_v39 = vmul.f32 %v1806_v43, %v1656_v49 }
0x1125   :  { %1664 = vst.msk [vmem:[#allocation7 + $0x8] sm:$0xff] %vm209_vm7, %v1662_v39 }
0x1126   :  { %1677 = dma.vmem_to_hbm [thread:$0]  %s1670_s20, 256, %s1672_s15, [#allocation6], %s1978_s9, %s1978_s9, %s1979_s23  }
0x1127   :  { %1965 = dma.done.wait [#allocation6], 256  }
0x1128   :  { %1966 = vsyncadd [#allocation6], 4294967040 }
0x1129   :  { %1682 = vsyncpa [#allocation5], 1 }
0x112a   :  { %1683 = vsyncpa [#allocation6], 1 }

</bundles_post_ra>
